<compile_context>
chip_gen: v7x
topology: tpu7x:2x2x1
jax: 0.10.0
libtpu: 0.0.40
codegen_flags: <defaults>
</compile_context>

<pallas_src>
import numpy as np
import jax
import jax.numpy as jnp
from jax.experimental import pallas as pl
from jax.experimental.pallas import tpu as pltpu

# ---- constants from the reference module ----
ATOM_NUM = 45
MEASURED_QUBIT_IDX = 2
N_QUBITS = 5                      # layer-1 circuits: 2**5 = 32 amplitudes
MEASURED_QUBIT_2ND_IDX = 7
N_2ND_QUBITS = 9                  # layer-2 circuit : 2**9 = 512 amplitudes
N_LAYERS = 1
N_2ND_LAYERS = 3
PAD_VALUE = 0.001
BLOCK_W = 128                     # MXU-native width for packed layer-1 observables


# =====================================================================
# Host-side (setup/glue) construction of the dense observables
#   A = Re( U^dagger Z_w U )  for a StronglyEntanglingLayers circuit.
# =====================================================================
def _rz(a):
    return np.array([[np.exp(-0.5j * a), 0.0], [0.0, np.exp(0.5j * a)]],
                    dtype=np.complex128)


def _ry(t):
    return np.array([[np.cos(t / 2), -np.sin(t / 2)],
                     [np.sin(t / 2), np.cos(t / 2)]], dtype=np.complex128)


def _rot(phi, theta, omega):
    # qml.Rot(phi, theta, omega) = RZ(omega) RY(theta) RZ(phi)
    return _rz(omega) @ _ry(theta) @ _rz(phi)


def _apply_1q(U, gate, wire, n):
    # Left-multiply U by (I (x) gate (x) I) on `wire` (wire 0 = MSB, PennyLane order).
    dim = 2 ** n
    Ur = U.reshape(2 ** wire, 2, (2 ** (n - 1 - wire)) * dim)
    Ur = np.einsum('ab,xby->xay', gate, Ur)
    return Ur.reshape(dim, dim)


def _apply_cnot(U, control, target, n):
    # Left-multiply U by CNOT(control -> target): a pure row permutation.
    dim = 2 ** n
    idx = np.arange(dim)
    cbit = (idx >> (n - 1 - control)) & 1
    src = np.where(cbit == 1, idx ^ (1 << (n - 1 - target)), idx)
    return U[src, :]


def _strongly_entangling_unitary(weights, n):
    weights = np.asarray(weights, dtype=np.float64)
    L = weights.shape[0]
    U = np.eye(2 ** n, dtype=np.complex128)
    for l in range(L):
        for q in range(n):
            U = _apply_1q(U, _rot(*weights[l, q]), q, n)
        r = (l % (n - 1)) + 1                      # default `ranges` of the template
        for q in range(n):
            U = _apply_cnot(U, q, (q + r) % n, n)
    return U


def observable_matrix(weights, n, measured_wire):
    U = _strongly_entangling_unitary(weights, n)
    dim = 2 ** n
    idx = np.arange(dim)
    z = 1.0 - 2.0 * ((idx >> (n - 1 - measured_wire)) & 1)   # diag(Z on measured wire)
    M = (U.conj().T * z[None, :]) @ U                        # Hermitian
    return np.real(M)                                        # psi real -> only Re(M)


def build_params(w1, w2, d_features):
    """Fold the AmplitudeEmbedding pad_with=0.001 padding of both layers into
    (quadratic, linear, scalar) terms and pack the 45 per-atom observables into
    MXU-native 128-wide block-diagonal blocks (plus one ragged tail block)."""
    c = PAD_VALUE
    d = d_features
    dim1, dim2 = 2 ** N_QUBITS, 2 ** N_2ND_QUBITS
    A = ATOM_NUM
    F = A * d
    assert BLOCK_W % d == 0, "per-atom feature count must divide 128"
    assert F > BLOCK_W, "flattened feature dim must exceed one MXU block"

    a1_full = np.stack([observable_matrix(w1[i], N_QUBITS, MEASURED_QUBIT_IDX)
                        for i in range(A)])                            # (45, 32, 32)
    a2_full = observable_matrix(w2, N_2ND_QUBITS, MEASURED_QUBIT_2ND_IDX)  # (512, 512)

    # ---- layer-1 folding (per atom, pad d -> 32) ----
    a1 = a1_full[:, :d, :d]                                            # (45, d, d)
    b1 = 2.0 * c * a1_full[:, :d, d:].sum(axis=2)                      # (45, d)
    s1 = (c * c) * a1_full[:, d:, d:].sum(axis=(1, 2))                 # (45,)
    n1_pad = (dim1 - d) * c * c

    # ---- layer-2 folding (pad 45 -> 512) ----
    a2 = a2_full[:A, :A]                                               # (45, 45)
    b2 = 2.0 * c * a2_full[:A, A:].sum(axis=1)                         # (45,)
    s2 = (c * c) * a2_full[A:, A:].sum()
    n2_pad = (dim2 - A) * c * c

    # ---- pack per-atom observables block-diagonally into 128-wide blocks ----
    apb = BLOCK_W // d                   # atoms per full block (8 for d=16)
    nb = F // BLOCK_W                    # number of full 128-wide blocks (5)
    tail = F - nb * BLOCK_W              # ragged tail width (80 for d=16)
    assert tail > 0
    a1b = np.zeros((nb, BLOCK_W, BLOCK_W), np.float32)
    for a in range(nb * apb):
        g, i = divmod(a, apb)
        a1b[g, i * d:(i + 1) * d, i * d:(i + 1) * d] = a1[a]
    a1t = np.zeros((tail, tail), np.float32)
    for i, a in enumerate(range(nb * apb, A)):
        a1t[i * d:(i + 1) * d, i * d:(i + 1) * d] = a1[a]

    # ---- lane-dense (F, 45) segment-sum selector and folded linear terms ----
    seg = np.zeros((F, A), np.float32)
    b1m = np.zeros((F, A), np.float32)
    for a in range(A):
        seg[a * d:(a + 1) * d, a] = 1.0
        b1m[a * d:(a + 1) * d, a] = b1[a]

    s1r = s1.reshape(1, A).astype(np.float32)
    b2r = b2.reshape(1, A).astype(np.float32)
    scal = np.array([s2, n1_pad, n2_pad], np.float32)                  # SMEM constants

    bf = jnp.bfloat16
    return (jnp.asarray(a1b, bf), jnp.asarray(a1t, bf), jnp.asarray(seg, bf),
            jnp.asarray(b1m, bf), jnp.asarray(s1r), jnp.asarray(a2, jnp.float32),
            jnp.asarray(b2r), jnp.asarray(scal))


# =====================================================================
# Fused Pallas kernel: layer-1 expvals -> layer-2 expval -> softmax
# =====================================================================
def _hybrid_fused_kernel(x_ref, a1b_ref, a1t_ref, seg_ref, b1_ref, s1_ref,
                         a2_ref, b2_ref, scal_ref, o_ref):
    # x_ref   : (tb, F=45*D) raw per-atom features, lane-dense (natural order)
    # a1b_ref : (nb, 128, 128) bf16 block-diagonal packed layer-1 observables
    # a1t_ref : (tail, tail)   bf16 ragged tail block
    # seg_ref : (F, 45) bf16 segment-sum selector (per-atom column indicators)
    # b1_ref  : (F, 45) bf16 folded layer-1 linear terms
    # s1_ref  : (1, 45) f32  folded layer-1 scalar terms
    # a2_ref  : (45, 45) f32 folded layer-2 observable
    # b2_ref  : (1, 45) f32  folded layer-2 linear term
    # scal_ref: SMEM (3,)    [s2, n1_pad, n2_pad]
    # o_ref   : (tb, 1)      softmax output
    f32 = jnp.float32
    bf16 = jnp.bfloat16
    tb = x_ref.shape[0]
    n_atoms = seg_ref.shape[1]
    nb = a1b_ref.shape[0]
    tail = a1t_ref.shape[0]

    s2 = scal_ref[0]
    n1_pad = scal_ref[1]
    n2_pad = scal_ref[2]

    quad1 = jnp.zeros((tb, n_atoms), f32)
    lin1 = jnp.zeros((tb, n_atoms), f32)
    den1 = jnp.zeros((tb, n_atoms), f32)

    def contrib(xg, a1_blk, seg_blk, b1_blk):
        # bf16 MXU operands, f32 accumulation; elementwise math stays f32 (v5e VPU).
        xh = xg.astype(bf16)
        vg = jnp.dot(xh, a1_blk, preferred_element_type=f32)         # per-atom A1 x
        q = jnp.dot((xg * vg).astype(bf16), seg_blk, preferred_element_type=f32)
        l = jnp.dot(xh, b1_blk, preferred_element_type=f32)
        dn = jnp.dot((xg * xg).astype(bf16), seg_blk, preferred_element_type=f32)
        return q, l, dn

    # ---- layer 1: 45 per-atom quadratic forms via 128-wide block-diag matmuls ----
    for g in range(nb):                                   # statically unrolled
        lo, hi = g * BLOCK_W, (g + 1) * BLOCK_W
        q, l, dn = contrib(x_ref[:, lo:hi], a1b_ref[g],
                           seg_ref[lo:hi, :], b1_ref[lo:hi, :])
        quad1 += q
        lin1 += l
        den1 += dn
    lo = nb * BLOCK_W                                     # ragged tail block
    q, l, dn = contrib(x_ref[:, lo:lo + tail], a1t_ref[...],
                       seg_ref[lo:lo + tail, :], b1_ref[lo:lo + tail, :])
    quad1 += q
    lin1 += l
    den1 += dn

    # per-atom <Z_2> with the 0.001 amplitude padding + normalization folded in
    y = (quad1 + lin1 + s1_ref[...]) / (den1 + n1_pad)               # (tb, 45)

    # ---- layer 2: quadratic form over the 45 atom expvals (512-pad folded) --------
    t = jnp.dot(y, a2_ref[...], preferred_element_type=f32) + b2_ref[...]
    num2 = jnp.sum(y * t, axis=-1, keepdims=True) + s2
    den2 = jnp.sum(y * y, axis=-1, keepdims=True) + n2_pad
    e = num2 / den2                                                  # (tb, 1) <Z_7>

    # ---- torch.nn.Softmax(dim=1) over the size-1 feature dim (identically 1.0) ----
    m = jnp.max(e, axis=-1, keepdims=True)
    ex = jnp.exp(e - m)
    o_ref[...] = ex / jnp.sum(ex, axis=-1, keepdims=True)


# =====================================================================
# Model wrapper
# =====================================================================
def hybrid_model_forward(x, a1b, a1t, seg, b1m, s1r, a2, b2r, scal, *, tile_b=512):
    """x: (B, ATOM_NUM, D) float; remaining args from build_params()."""
    B, atoms, d = x.shape
    F = atoms * d
    assert atoms == ATOM_NUM
    assert a1b.shape[0] * BLOCK_W + a1t.shape[0] == F
    assert tile_b % 8 == 0

    # Natural-order, lane-dense view of x: a free contiguous reshape.  No pad, no
    # transpose -- the 45->48 / ragged handling lives in the packed constants and in
    # Pallas partial blocks.
    x2 = x.reshape(B, F).astype(jnp.float32)

    tb = tile_b if B > tile_b else B        # full batch as one block for small B
    grid = (pl.cdiv(B, tb),)

    out = pl.pallas_call(
        _hybrid_fused_kernel,
        out_shape=jax.ShapeDtypeStruct((B, 1), jnp.float32),
        grid=grid,
        in_specs=[
            pl.BlockSpec((tb, F), lambda i: (i, 0)),            # x tile (lane-dense)
            pl.BlockSpec(a1b.shape, lambda i: (0, 0, 0)),       # packed A1 blocks
            pl.BlockSpec(a1t.shape, lambda i: (0, 0)),          # ragged A1 tail
            pl.BlockSpec(seg.shape, lambda i: (0, 0)),          # segment-sum selector
            pl.BlockSpec(b1m.shape, lambda i: (0, 0)),          # layer-1 linear terms
            pl.BlockSpec(s1r.shape, lambda i: (0, 0)),          # layer-1 scalar terms
            pl.BlockSpec(a2.shape, lambda i: (0, 0)),           # layer-2 observable
            pl.BlockSpec(b2r.shape, lambda i: (0, 0)),          # layer-2 linear term
            pl.BlockSpec(memory_space=pltpu.MemorySpace.SMEM),  # [s2, n1_pad, n2_pad]
        ],
        out_specs=pl.BlockSpec((tb, 1), lambda i: (i, 0)),
        compiler_params=pltpu.CompilerParams(
            dimension_semantics=("parallel",),                  # shard batch on v7x TCs
            vmem_limit_bytes=32 * 1024 * 1024,                  # fits v5e/v6e/v7x
        ),
    )(x2, a1b, a1t, seg, b1m, s1r, a2, b2r, scal)

    return out                                                   # (B, 1)


if __name__ == "__main__":
    key = jax.random.PRNGKey(0)
    k_x, k_w1, k_w2 = jax.random.split(key, 3)

    B, D = 2, 16                                   # D <= 2**N_QUBITS features per atom
    x = jax.random.normal(k_x, (B, ATOM_NUM, D), dtype=jnp.float32)

    # deterministic circuit weights (TorchLayer default init: uniform[0, 2*pi))
    w1 = np.asarray(jax.random.uniform(k_w1, (ATOM_NUM, N_LAYERS, N_QUBITS, 3),
                                       minval=0.0, maxval=2.0 * np.pi))
    w2 = np.asarray(jax.random.uniform(k_w2, (N_2ND_LAYERS, N_2ND_QUBITS, 3),
                                       minval=0.0, maxval=2.0 * np.pi))

    params = build_params(w1, w2, D)

    fwd = jax.jit(hybrid_model_forward)
    out = jax.block_until_ready(fwd(x, *params))

    assert out.shape == (B, 1)
    assert bool(jnp.all(jnp.isfinite(out)))
    # Softmax over a size-1 dim is identically 1.0 (faithful to the reference model).
    assert bool(jnp.allclose(out, 1.0, atol=1e-6))
    print("KERNEL_OK")
</pallas_src>

<mosaic_0001>
module attributes {stable_mosaic.version = 11 : i64} {
  func.func @_hybrid_fused_kernel(%arg0: i32, %arg1: memref<2x720xf32, #tpu.memory_space<vmem>>, %arg2: memref<5x128x128xbf16, #tpu.memory_space<vmem>>, %arg3: memref<80x80xbf16, #tpu.memory_space<vmem>>, %arg4: memref<720x45xbf16, #tpu.memory_space<vmem>>, %arg5: memref<720x45xbf16, #tpu.memory_space<vmem>>, %arg6: memref<1x45xf32, #tpu.memory_space<vmem>>, %arg7: memref<45x45xf32, #tpu.memory_space<vmem>>, %arg8: memref<1x45xf32, #tpu.memory_space<vmem>>, %arg9: memref<3xf32, #tpu.memory_space<smem>>, %arg10: memref<2x1xf32, #tpu.memory_space<vmem>>) attributes {dimension_semantics = [#tpu.dimension_semantics<parallel>], iteration_bounds = array<i64: 1>, scalar_prefetch = 0 : i64, scratch_operands = 0 : i64, tpu.core_type = #tpu.core_type<tc>, window_params = [{transform_indices = @transform_0, window_bounds = array<i64: 2, 720>}, {pipeline_mode = #tpu.pipeline_mode<synchronous>, transform_indices = @transform_1, window_bounds = array<i64: 5, 128, 128>}, {pipeline_mode = #tpu.pipeline_mode<synchronous>, transform_indices = @transform_2, window_bounds = array<i64: 80, 80>}, {pipeline_mode = #tpu.pipeline_mode<synchronous>, transform_indices = @transform_3, window_bounds = array<i64: 720, 45>}, {pipeline_mode = #tpu.pipeline_mode<synchronous>, transform_indices = @transform_4, window_bounds = array<i64: 720, 45>}, {pipeline_mode = #tpu.pipeline_mode<synchronous>, transform_indices = @transform_5, window_bounds = array<i64: 1, 45>}, {pipeline_mode = #tpu.pipeline_mode<synchronous>, transform_indices = @transform_6, window_bounds = array<i64: 45, 45>}, {pipeline_mode = #tpu.pipeline_mode<synchronous>, transform_indices = @transform_7, window_bounds = array<i64: 1, 45>}, {transform_indices = @transform_8, window_bounds = array<i64: 3>}, {transform_indices = @transform_9, window_bounds = array<i64: 2, 1>}]} {
    %c0 = arith.constant 0 : index
    %0 = memref.load %arg9[%c0] : memref<3xf32, #tpu.memory_space<smem>>
    %c1 = arith.constant 1 : index
    %1 = memref.load %arg9[%c1] : memref<3xf32, #tpu.memory_space<smem>>
    %c2 = arith.constant 2 : index
    %2 = memref.load %arg9[%c2] : memref<3xf32, #tpu.memory_space<smem>>
    %cst = arith.constant 0.000000e+00 : f32
    %3 = vector.broadcast %cst : f32 to vector<2x45xf32>
    %cst_0 = arith.constant 0.000000e+00 : f32
    %4 = vector.broadcast %cst_0 : f32 to vector<2x45xf32>
    %cst_1 = arith.constant 0.000000e+00 : f32
    %5 = vector.broadcast %cst_1 : f32 to vector<2x45xf32>
    %c0_2 = arith.constant 0 : index
    %c0_3 = arith.constant 0 : index
    %6 = vector.load %arg1[%c0_2, %c0_3] : memref<2x720xf32, #tpu.memory_space<vmem>>, vector<2x128xf32>
    %c0_4 = arith.constant 0 : index
    %c0_5 = arith.constant 0 : index
    %c0_6 = arith.constant 0 : index
    %7 = vector.load %arg2[%c0_4, %c0_5, %c0_6] : memref<5x128x128xbf16, #tpu.memory_space<vmem>>, vector<1x128x128xbf16>
    %8 = vector.shape_cast %7 : vector<1x128x128xbf16> to vector<128x128xbf16>
    %c0_7 = arith.constant 0 : index
    %c0_8 = arith.constant 0 : index
    %9 = vector.load %arg4[%c0_7, %c0_8] : memref<720x45xbf16, #tpu.memory_space<vmem>>, vector<128x45xbf16>
    %c0_9 = arith.constant 0 : index
    %c0_10 = arith.constant 0 : index
    %10 = vector.load %arg5[%c0_9, %c0_10] : memref<720x45xbf16, #tpu.memory_space<vmem>>, vector<128x45xbf16>
    %11 = arith.truncf %6 : vector<2x128xf32> to vector<2x128xbf16>
    %cst_11 = arith.constant dense<0.000000e+00> : vector<2x128xf32>
    %12 = tpu.matmul %11, %8, %cst_11 {dimension_numbers = #tpu.dot_dimension_numbers<[1], [0], [0], [1], [0, 0, 1, 1], [], []>} : vector<2x128xbf16>, vector<128x128xbf16>, vector<2x128xf32> -> vector<2x128xf32>
    %13 = arith.mulf %6, %12 : vector<2x128xf32>
    %14 = arith.truncf %13 : vector<2x128xf32> to vector<2x128xbf16>
    %cst_12 = arith.constant dense<0.000000e+00> : vector<2x45xf32>
    %15 = tpu.matmul %14, %9, %cst_12 {dimension_numbers = #tpu.dot_dimension_numbers<[1], [0], [0], [1], [0, 0, 1, 1], [], []>} : vector<2x128xbf16>, vector<128x45xbf16>, vector<2x45xf32> -> vector<2x45xf32>
    %cst_13 = arith.constant dense<0.000000e+00> : vector<2x45xf32>
    %16 = tpu.matmul %11, %10, %cst_13 {dimension_numbers = #tpu.dot_dimension_numbers<[1], [0], [0], [1], [0, 0, 1, 1], [], []>} : vector<2x128xbf16>, vector<128x45xbf16>, vector<2x45xf32> -> vector<2x45xf32>
    %17 = arith.mulf %6, %6 : vector<2x128xf32>
    %18 = arith.truncf %17 : vector<2x128xf32> to vector<2x128xbf16>
    %cst_14 = arith.constant dense<0.000000e+00> : vector<2x45xf32>
    %19 = tpu.matmul %18, %9, %cst_14 {dimension_numbers = #tpu.dot_dimension_numbers<[1], [0], [0], [1], [0, 0, 1, 1], [], []>} : vector<2x128xbf16>, vector<128x45xbf16>, vector<2x45xf32> -> vector<2x45xf32>
    %20 = arith.addf %3, %15 : vector<2x45xf32>
    %21 = arith.addf %4, %16 : vector<2x45xf32>
    %22 = arith.addf %5, %19 : vector<2x45xf32>
    %c0_15 = arith.constant 0 : index
    %c128 = arith.constant 128 : index
    %23 = vector.load %arg1[%c0_15, %c128] : memref<2x720xf32, #tpu.memory_space<vmem>>, vector<2x128xf32>
    %c1_16 = arith.constant 1 : index
    %c0_17 = arith.constant 0 : index
    %c0_18 = arith.constant 0 : index
    %24 = vector.load %arg2[%c1_16, %c0_17, %c0_18] : memref<5x128x128xbf16, #tpu.memory_space<vmem>>, vector<1x128x128xbf16>
    %25 = vector.shape_cast %24 : vector<1x128x128xbf16> to vector<128x128xbf16>
    %c128_19 = arith.constant 128 : index
    %c0_20 = arith.constant 0 : index
    %26 = vector.load %arg4[%c128_19, %c0_20] : memref<720x45xbf16, #tpu.memory_space<vmem>>, vector<128x45xbf16>
    %c128_21 = arith.constant 128 : index
    %c0_22 = arith.constant 0 : index
    %27 = vector.load %arg5[%c128_21, %c0_22] : memref<720x45xbf16, #tpu.memory_space<vmem>>, vector<128x45xbf16>
    %28 = arith.truncf %23 : vector<2x128xf32> to vector<2x128xbf16>
    %cst_23 = arith.constant dense<0.000000e+00> : vector<2x128xf32>
    %29 = tpu.matmul %28, %25, %cst_23 {dimension_numbers = #tpu.dot_dimension_numbers<[1], [0], [0], [1], [0, 0, 1, 1], [], []>} : vector<2x128xbf16>, vector<128x128xbf16>, vector<2x128xf32> -> vector<2x128xf32>
    %30 = arith.mulf %23, %29 : vector<2x128xf32>
    %31 = arith.truncf %30 : vector<2x128xf32> to vector<2x128xbf16>
    %cst_24 = arith.constant dense<0.000000e+00> : vector<2x45xf32>
    %32 = tpu.matmul %31, %26, %cst_24 {dimension_numbers = #tpu.dot_dimension_numbers<[1], [0], [0], [1], [0, 0, 1, 1], [], []>} : vector<2x128xbf16>, vector<128x45xbf16>, vector<2x45xf32> -> vector<2x45xf32>
    %cst_25 = arith.constant dense<0.000000e+00> : vector<2x45xf32>
    %33 = tpu.matmul %28, %27, %cst_25 {dimension_numbers = #tpu.dot_dimension_numbers<[1], [0], [0], [1], [0, 0, 1, 1], [], []>} : vector<2x128xbf16>, vector<128x45xbf16>, vector<2x45xf32> -> vector<2x45xf32>
    %34 = arith.mulf %23, %23 : vector<2x128xf32>
    %35 = arith.truncf %34 : vector<2x128xf32> to vector<2x128xbf16>
    %cst_26 = arith.constant dense<0.000000e+00> : vector<2x45xf32>
    %36 = tpu.matmul %35, %26, %cst_26 {dimension_numbers = #tpu.dot_dimension_numbers<[1], [0], [0], [1], [0, 0, 1, 1], [], []>} : vector<2x128xbf16>, vector<128x45xbf16>, vector<2x45xf32> -> vector<2x45xf32>
    %37 = arith.addf %20, %32 : vector<2x45xf32>
    %38 = arith.addf %21, %33 : vector<2x45xf32>
    %39 = arith.addf %22, %36 : vector<2x45xf32>
    %c0_27 = arith.constant 0 : index
    %c256 = arith.constant 256 : index
    %40 = vector.load %arg1[%c0_27, %c256] : memref<2x720xf32, #tpu.memory_space<vmem>>, vector<2x128xf32>
    %c2_28 = arith.constant 2 : index
    %c0_29 = arith.constant 0 : index
    %c0_30 = arith.constant 0 : index
    %41 = vector.load %arg2[%c2_28, %c0_29, %c0_30] : memref<5x128x128xbf16, #tpu.memory_space<vmem>>, vector<1x128x128xbf16>
    %42 = vector.shape_cast %41 : vector<1x128x128xbf16> to vector<128x128xbf16>
    %c256_31 = arith.constant 256 : index
    %c0_32 = arith.constant 0 : index
    %43 = vector.load %arg4[%c256_31, %c0_32] : memref<720x45xbf16, #tpu.memory_space<vmem>>, vector<128x45xbf16>
    %c256_33 = arith.constant 256 : index
    %c0_34 = arith.constant 0 : index
    %44 = vector.load %arg5[%c256_33, %c0_34] : memref<720x45xbf16, #tpu.memory_space<vmem>>, vector<128x45xbf16>
    %45 = arith.truncf %40 : vector<2x128xf32> to vector<2x128xbf16>
    %cst_35 = arith.constant dense<0.000000e+00> : vector<2x128xf32>
    %46 = tpu.matmul %45, %42, %cst_35 {dimension_numbers = #tpu.dot_dimension_numbers<[1], [0], [0], [1], [0, 0, 1, 1], [], []>} : vector<2x128xbf16>, vector<128x128xbf16>, vector<2x128xf32> -> vector<2x128xf32>
    %47 = arith.mulf %40, %46 : vector<2x128xf32>
    %48 = arith.truncf %47 : vector<2x128xf32> to vector<2x128xbf16>
    %cst_36 = arith.constant dense<0.000000e+00> : vector<2x45xf32>
    %49 = tpu.matmul %48, %43, %cst_36 {dimension_numbers = #tpu.dot_dimension_numbers<[1], [0], [0], [1], [0, 0, 1, 1], [], []>} : vector<2x128xbf16>, vector<128x45xbf16>, vector<2x45xf32> -> vector<2x45xf32>
    %cst_37 = arith.constant dense<0.000000e+00> : vector<2x45xf32>
    %50 = tpu.matmul %45, %44, %cst_37 {dimension_numbers = #tpu.dot_dimension_numbers<[1], [0], [0], [1], [0, 0, 1, 1], [], []>} : vector<2x128xbf16>, vector<128x45xbf16>, vector<2x45xf32> -> vector<2x45xf32>
    %51 = arith.mulf %40, %40 : vector<2x128xf32>
    %52 = arith.truncf %51 : vector<2x128xf32> to vector<2x128xbf16>
    %cst_38 = arith.constant dense<0.000000e+00> : vector<2x45xf32>
    %53 = tpu.matmul %52, %43, %cst_38 {dimension_numbers = #tpu.dot_dimension_numbers<[1], [0], [0], [1], [0, 0, 1, 1], [], []>} : vector<2x128xbf16>, vector<128x45xbf16>, vector<2x45xf32> -> vector<2x45xf32>
    %54 = arith.addf %37, %49 : vector<2x45xf32>
    %55 = arith.addf %38, %50 : vector<2x45xf32>
    %56 = arith.addf %39, %53 : vector<2x45xf32>
    %c0_39 = arith.constant 0 : index
    %c384 = arith.constant 384 : index
    %57 = vector.load %arg1[%c0_39, %c384] : memref<2x720xf32, #tpu.memory_space<vmem>>, vector<2x128xf32>
    %c3 = arith.constant 3 : index
    %c0_40 = arith.constant 0 : index
    %c0_41 = arith.constant 0 : index
    %58 = vector.load %arg2[%c3, %c0_40, %c0_41] : memref<5x128x128xbf16, #tpu.memory_space<vmem>>, vector<1x128x128xbf16>
    %59 = vector.shape_cast %58 : vector<1x128x128xbf16> to vector<128x128xbf16>
    %c384_42 = arith.constant 384 : index
    %c0_43 = arith.constant 0 : index
    %60 = vector.load %arg4[%c384_42, %c0_43] : memref<720x45xbf16, #tpu.memory_space<vmem>>, vector<128x45xbf16>
    %c384_44 = arith.constant 384 : index
    %c0_45 = arith.constant 0 : index
    %61 = vector.load %arg5[%c384_44, %c0_45] : memref<720x45xbf16, #tpu.memory_space<vmem>>, vector<128x45xbf16>
    %62 = arith.truncf %57 : vector<2x128xf32> to vector<2x128xbf16>
    %cst_46 = arith.constant dense<0.000000e+00> : vector<2x128xf32>
    %63 = tpu.matmul %62, %59, %cst_46 {dimension_numbers = #tpu.dot_dimension_numbers<[1], [0], [0], [1], [0, 0, 1, 1], [], []>} : vector<2x128xbf16>, vector<128x128xbf16>, vector<2x128xf32> -> vector<2x128xf32>
    %64 = arith.mulf %57, %63 : vector<2x128xf32>
    %65 = arith.truncf %64 : vector<2x128xf32> to vector<2x128xbf16>
    %cst_47 = arith.constant dense<0.000000e+00> : vector<2x45xf32>
    %66 = tpu.matmul %65, %60, %cst_47 {dimension_numbers = #tpu.dot_dimension_numbers<[1], [0], [0], [1], [0, 0, 1, 1], [], []>} : vector<2x128xbf16>, vector<128x45xbf16>, vector<2x45xf32> -> vector<2x45xf32>
    %cst_48 = arith.constant dense<0.000000e+00> : vector<2x45xf32>
    %67 = tpu.matmul %62, %61, %cst_48 {dimension_numbers = #tpu.dot_dimension_numbers<[1], [0], [0], [1], [0, 0, 1, 1], [], []>} : vector<2x128xbf16>, vector<128x45xbf16>, vector<2x45xf32> -> vector<2x45xf32>
    %68 = arith.mulf %57, %57 : vector<2x128xf32>
    %69 = arith.truncf %68 : vector<2x128xf32> to vector<2x128xbf16>
    %cst_49 = arith.constant dense<0.000000e+00> : vector<2x45xf32>
    %70 = tpu.matmul %69, %60, %cst_49 {dimension_numbers = #tpu.dot_dimension_numbers<[1], [0], [0], [1], [0, 0, 1, 1], [], []>} : vector<2x128xbf16>, vector<128x45xbf16>, vector<2x45xf32> -> vector<2x45xf32>
    %71 = arith.addf %54, %66 : vector<2x45xf32>
    %72 = arith.addf %55, %67 : vector<2x45xf32>
    %73 = arith.addf %56, %70 : vector<2x45xf32>
    %c0_50 = arith.constant 0 : index
    %c512 = arith.constant 512 : index
    %74 = vector.load %arg1[%c0_50, %c512] : memref<2x720xf32, #tpu.memory_space<vmem>>, vector<2x128xf32>
    %c4 = arith.constant 4 : index
    %c0_51 = arith.constant 0 : index
    %c0_52 = arith.constant 0 : index
    %75 = vector.load %arg2[%c4, %c0_51, %c0_52] : memref<5x128x128xbf16, #tpu.memory_space<vmem>>, vector<1x128x128xbf16>
    %76 = vector.shape_cast %75 : vector<1x128x128xbf16> to vector<128x128xbf16>
    %c512_53 = arith.constant 512 : index
    %c0_54 = arith.constant 0 : index
    %77 = vector.load %arg4[%c512_53, %c0_54] : memref<720x45xbf16, #tpu.memory_space<vmem>>, vector<128x45xbf16>
    %c512_55 = arith.constant 512 : index
    %c0_56 = arith.constant 0 : index
    %78 = vector.load %arg5[%c512_55, %c0_56] : memref<720x45xbf16, #tpu.memory_space<vmem>>, vector<128x45xbf16>
    %79 = arith.truncf %74 : vector<2x128xf32> to vector<2x128xbf16>
    %cst_57 = arith.constant dense<0.000000e+00> : vector<2x128xf32>
    %80 = tpu.matmul %79, %76, %cst_57 {dimension_numbers = #tpu.dot_dimension_numbers<[1], [0], [0], [1], [0, 0, 1, 1], [], []>} : vector<2x128xbf16>, vector<128x128xbf16>, vector<2x128xf32> -> vector<2x128xf32>
    %81 = arith.mulf %74, %80 : vector<2x128xf32>
    %82 = arith.truncf %81 : vector<2x128xf32> to vector<2x128xbf16>
    %cst_58 = arith.constant dense<0.000000e+00> : vector<2x45xf32>
    %83 = tpu.matmul %82, %77, %cst_58 {dimension_numbers = #tpu.dot_dimension_numbers<[1], [0], [0], [1], [0, 0, 1, 1], [], []>} : vector<2x128xbf16>, vector<128x45xbf16>, vector<2x45xf32> -> vector<2x45xf32>
    %cst_59 = arith.constant dense<0.000000e+00> : vector<2x45xf32>
    %84 = tpu.matmul %79, %78, %cst_59 {dimension_numbers = #tpu.dot_dimension_numbers<[1], [0], [0], [1], [0, 0, 1, 1], [], []>} : vector<2x128xbf16>, vector<128x45xbf16>, vector<2x45xf32> -> vector<2x45xf32>
    %85 = arith.mulf %74, %74 : vector<2x128xf32>
    %86 = arith.truncf %85 : vector<2x128xf32> to vector<2x128xbf16>
    %cst_60 = arith.constant dense<0.000000e+00> : vector<2x45xf32>
    %87 = tpu.matmul %86, %77, %cst_60 {dimension_numbers = #tpu.dot_dimension_numbers<[1], [0], [0], [1], [0, 0, 1, 1], [], []>} : vector<2x128xbf16>, vector<128x45xbf16>, vector<2x45xf32> -> vector<2x45xf32>
    %88 = arith.addf %71, %83 : vector<2x45xf32>
    %89 = arith.addf %72, %84 : vector<2x45xf32>
    %90 = arith.addf %73, %87 : vector<2x45xf32>
    %c0_61 = arith.constant 0 : index
    %c640 = arith.constant 640 : index
    %91 = vector.load %arg1[%c0_61, %c640] : memref<2x720xf32, #tpu.memory_space<vmem>>, vector<2x80xf32>
    %c0_62 = arith.constant 0 : index
    %c0_63 = arith.constant 0 : index
    %92 = vector.load %arg3[%c0_62, %c0_63] : memref<80x80xbf16, #tpu.memory_space<vmem>>, vector<80x80xbf16>
    %c640_64 = arith.constant 640 : index
    %c0_65 = arith.constant 0 : index
    %93 = vector.load %arg4[%c640_64, %c0_65] : memref<720x45xbf16, #tpu.memory_space<vmem>>, vector<80x45xbf16>
    %c640_66 = arith.constant 640 : index
    %c0_67 = arith.constant 0 : index
    %94 = vector.load %arg5[%c640_66, %c0_67] : memref<720x45xbf16, #tpu.memory_space<vmem>>, vector<80x45xbf16>
    %95 = arith.truncf %91 : vector<2x80xf32> to vector<2x80xbf16>
    %cst_68 = arith.constant dense<0.000000e+00> : vector<2x80xf32>
    %96 = tpu.matmul %95, %92, %cst_68 {dimension_numbers = #tpu.dot_dimension_numbers<[1], [0], [0], [1], [0, 0, 1, 1], [], []>} : vector<2x80xbf16>, vector<80x80xbf16>, vector<2x80xf32> -> vector<2x80xf32>
    %97 = arith.mulf %91, %96 : vector<2x80xf32>
    %98 = arith.truncf %97 : vector<2x80xf32> to vector<2x80xbf16>
    %cst_69 = arith.constant dense<0.000000e+00> : vector<2x45xf32>
    %99 = tpu.matmul %98, %93, %cst_69 {dimension_numbers = #tpu.dot_dimension_numbers<[1], [0], [0], [1], [0, 0, 1, 1], [], []>} : vector<2x80xbf16>, vector<80x45xbf16>, vector<2x45xf32> -> vector<2x45xf32>
    %cst_70 = arith.constant dense<0.000000e+00> : vector<2x45xf32>
    %100 = tpu.matmul %95, %94, %cst_70 {dimension_numbers = #tpu.dot_dimension_numbers<[1], [0], [0], [1], [0, 0, 1, 1], [], []>} : vector<2x80xbf16>, vector<80x45xbf16>, vector<2x45xf32> -> vector<2x45xf32>
    %101 = arith.mulf %91, %91 : vector<2x80xf32>
    %102 = arith.truncf %101 : vector<2x80xf32> to vector<2x80xbf16>
    %cst_71 = arith.constant dense<0.000000e+00> : vector<2x45xf32>
    %103 = tpu.matmul %102, %93, %cst_71 {dimension_numbers = #tpu.dot_dimension_numbers<[1], [0], [0], [1], [0, 0, 1, 1], [], []>} : vector<2x80xbf16>, vector<80x45xbf16>, vector<2x45xf32> -> vector<2x45xf32>
    %104 = arith.addf %88, %99 : vector<2x45xf32>
    %105 = arith.addf %89, %100 : vector<2x45xf32>
    %106 = arith.addf %90, %103 : vector<2x45xf32>
    %107 = arith.addf %104, %105 : vector<2x45xf32>
    %c0_72 = arith.constant 0 : index
    %c0_73 = arith.constant 0 : index
    %108 = vector.load %arg6[%c0_72, %c0_73] : memref<1x45xf32, #tpu.memory_space<vmem>>, vector<1x45xf32>
    %109 = vector.broadcast %108 : vector<1x45xf32> to vector<2x45xf32>
    %110 = arith.addf %107, %109 : vector<2x45xf32>
    %111 = vector.broadcast %1 : f32 to vector<2x45xf32>
    %112 = arith.addf %106, %111 : vector<2x45xf32>
    %113 = arith.divf %110, %112 : vector<2x45xf32>
    %c0_74 = arith.constant 0 : index
    %c0_75 = arith.constant 0 : index
    %114 = vector.load %arg7[%c0_74, %c0_75] : memref<45x45xf32, #tpu.memory_space<vmem>>, vector<45x45xf32>
    %cst_76 = arith.constant dense<0.000000e+00> : vector<2x45xf32>
    %115 = tpu.matmul %113, %114, %cst_76 {dimension_numbers = #tpu.dot_dimension_numbers<[1], [0], [0], [1], [0, 0, 1, 1], [], []>} : vector<2x45xf32>, vector<45x45xf32>, vector<2x45xf32> -> vector<2x45xf32>
    %c0_77 = arith.constant 0 : index
    %c0_78 = arith.constant 0 : index
    %116 = vector.load %arg8[%c0_77, %c0_78] : memref<1x45xf32, #tpu.memory_space<vmem>>, vector<1x45xf32>
    %117 = vector.broadcast %116 : vector<1x45xf32> to vector<2x45xf32>
    %118 = arith.addf %115, %117 : vector<2x45xf32>
    %119 = arith.mulf %113, %118 : vector<2x45xf32>
    %cst_79 = arith.constant dense<0.000000e+00> : vector<2xf32>
    %120 = vector.multi_reduction <add>, %119, %cst_79 [1] : vector<2x45xf32> to vector<2xf32>
    %121 = vector.shape_cast %120 : vector<2xf32> to vector<2x1xf32>
    %122 = vector.broadcast %0 : f32 to vector<2x1xf32>
    %123 = arith.addf %121, %122 : vector<2x1xf32>
    %124 = arith.mulf %113, %113 : vector<2x45xf32>
    %cst_80 = arith.constant dense<0.000000e+00> : vector<2xf32>
    %125 = vector.multi_reduction <add>, %124, %cst_80 [1] : vector<2x45xf32> to vector<2xf32>
    %126 = vector.shape_cast %125 : vector<2xf32> to vector<2x1xf32>
    %127 = vector.broadcast %2 : f32 to vector<2x1xf32>
    %128 = arith.addf %126, %127 : vector<2x1xf32>
    %129 = arith.divf %123, %128 : vector<2x1xf32>
    %cst_81 = arith.constant dense<0xFF800000> : vector<2xf32>
    %130 = vector.multi_reduction <maximumf>, %129, %cst_81 [1] : vector<2x1xf32> to vector<2xf32>
    %131 = vector.shape_cast %130 : vector<2xf32> to vector<2x1xf32>
    %132 = arith.subf %129, %131 : vector<2x1xf32>
    %133 = math.exp %132 : vector<2x1xf32>
    %cst_82 = arith.constant dense<0.000000e+00> : vector<2xf32>
    %134 = vector.multi_reduction <add>, %133, %cst_82 [1] : vector<2x1xf32> to vector<2xf32>
    %135 = vector.shape_cast %134 : vector<2xf32> to vector<2x1xf32>
    %136 = arith.divf %133, %135 : vector<2x1xf32>
    %c0_83 = arith.constant 0 : index
    %c0_84 = arith.constant 0 : index
    %137 = vector.load %arg10[%c0_83, %c0_84] : memref<2x1xf32, #tpu.memory_space<vmem>>, vector<2x1xf32>
    tpu.vector_store %arg10[%c0_83, %c0_84], %136 {strides = array<i32>} : memref<2x1xf32, #tpu.memory_space<vmem>>, vector<2x1xf32>,
    return
  }
  func.func @transform_0(%arg0: i32) -> (i32, i32) {
    %c0_i32 = arith.constant 0 : i32
    %c0_i32_0 = arith.constant 0 : i32
    return %arg0, %c0_i32 : i32, i32
  }
  func.func @transform_1(%arg0: i32) -> (i32, i32, i32) {
    %c0_i32 = arith.constant 0 : i32
    %c0_i32_0 = arith.constant 0 : i32
    %c0_i32_1 = arith.constant 0 : i32
    %c0_i32_2 = arith.constant 0 : i32
    return %c0_i32, %c0_i32_0, %c0_i32_1 : i32, i32, i32
  }
  func.func @transform_2(%arg0: i32) -> (i32, i32) {
    %c0_i32 = arith.constant 0 : i32
    %c0_i32_0 = arith.constant 0 : i32
    %c0_i32_1 = arith.constant 0 : i32
    return %c0_i32, %c0_i32_0 : i32, i32
  }
  func.func @transform_3(%arg0: i32) -> (i32, i32) {
    %c0_i32 = arith.constant 0 : i32
    %c0_i32_0 = arith.constant 0 : i32
    %c0_i32_1 = arith.constant 0 : i32
    return %c0_i32, %c0_i32_0 : i32, i32
  }
  func.func @transform_4(%arg0: i32) -> (i32, i32) {
    %c0_i32 = arith.constant 0 : i32
    %c0_i32_0 = arith.constant 0 : i32
    %c0_i32_1 = arith.constant 0 : i32
    return %c0_i32, %c0_i32_0 : i32, i32
  }
  func.func @transform_5(%arg0: i32) -> (i32, i32) {
    %c0_i32 = arith.constant 0 : i32
    %c0_i32_0 = arith.constant 0 : i32
    %c0_i32_1 = arith.constant 0 : i32
    return %c0_i32, %c0_i32_0 : i32, i32
  }
  func.func @transform_6(%arg0: i32) -> (i32, i32) {
    %c0_i32 = arith.constant 0 : i32
    %c0_i32_0 = arith.constant 0 : i32
    %c0_i32_1 = arith.constant 0 : i32
    return %c0_i32, %c0_i32_0 : i32, i32
  }
  func.func @transform_7(%arg0: i32) -> (i32, i32) {
    %c0_i32 = arith.constant 0 : i32
    %c0_i32_0 = arith.constant 0 : i32
    %c0_i32_1 = arith.constant 0 : i32
    return %c0_i32, %c0_i32_0 : i32, i32
  }
  func.func @transform_8(%arg0: i32) -> i32 {
    %c0_i32 = arith.constant 0 : i32
    %c0_i32_0 = arith.constant 0 : i32
    return %c0_i32 : i32
  }
  func.func @transform_9(%arg0: i32) -> (i32, i32) {
    %c0_i32 = arith.constant 0 : i32
    %c0_i32_0 = arith.constant 0 : i32
    return %arg0, %c0_i32 : i32, i32
  }
}

</mosaic_0001>

<bundles_post_ra>
// kernel: hybrid_model_forward.1
= control target key start
LH: loop header
LB: loop body
LE: loop exit
PB: predicated region body
PF: predicated region fallthrough
CT: control target
= control target key end

     0   :  { %14 = vsyncpa [#allocation3], 0  ;;  %s4203_s0 = inlined_call_operand.vmem [shape: f32[2,720], index: 0, kind: input, shape index: {}]   ;;  %s4204_s1 = inlined_call_operand.vmem [shape: bf16[5,128,128], index: 1, kind: input, shape index: {}]   ;;  %s4205_s2 = inlined_call_operand.vmem [shape: bf16[80,80], index: 2, kind: input, shape index: {}]   ;;  %s4206_s3 = inlined_call_operand.vmem [shape: bf16[720,45], index: 3, kind: input, shape index: {}]   ;;  %s4207_s4 = inlined_call_operand.vmem [shape: bf16[720,45], index: 4, kind: input, shape index: {}]   ;;  %s4208_s5 = inlined_call_operand.vmem [shape: f32[1,45], index: 5, kind: input, shape index: {}]   ;;  %s4209_s6 = inlined_call_operand.vmem [shape: f32[45,45], index: 6, kind: input, shape index: {}]   ;;  %s4210_s7 = inlined_call_operand.vmem [shape: f32[1,45], index: 7, kind: input, shape index: {}]   ;;  %s4211_s8 = inlined_call_operand.vmem [shape: f32[3], index: 8, kind: input, shape index: {}]   ;;  %s4212_s9 = inlined_call_operand.vmem [shape: f32[2,1], index: 9, kind: output, shape index: {}]  }
   0x1   :  { %s37_s11 = sshll.u32 %s4211_s8, 4  ;;  %s38_s11 = int_to_ptr.vmem [resolvable:$true] %s37_s11 }
   0x2   :  { %s3332_s12 = scalar_lea.vmem %s38_s11, 16  ;;  %p3337_p1 = scmp.lt.s32.totalorder %s38_s11, %s38_s11 }
   0x3   :  { %p3333_p0 = scmp.ne.s32.totalorder %s38_s11, %s3332_s12  ;;  %p3338_p2 = scmp.lt.s32.totalorder %s3332_s12, %s3332_s12 }
   0x5   :  { %p3339_p3 = por %p3338_p2, %p3337_p1 }
   0x7   :  { %p3340_p4 = pnand %p3339_p3, %p3333_p0 }
   0x9   :  { %3343 = shalt.err (!%p3340_p4)
}
   0xa   :  { %s3346_s13 = smov [#allocation2]  }
   0xb   :  { %40 = dma.vmem_to_smem %s38_s11, 16, %s3346_s13, [#allocation3]  }
   0xc   :  { %3344 = dma.done.wait [#allocation3], 16  }
   0xd   :  { %3345 = vsyncadd [#allocation3], 4294967280 }
   0xe   :  { %44 = sfence }
   0xf   :  { %v3189_v0 = vld [vmem:[%s4204_s1] sm:$0xff]   ;;  %v3347_v1 = vmov 0.0   ;;  %v3191_v3 = vld [vmem:[%s4204_s1 + $0x8] sm:$0xff]   ;;  %vm3348_vm0 = vmmov 0   ;;  %v3193_v5 = vld [vmem:[%s4204_s1 + $0x10] sm:$0xff]   ;;  %vm1914_vm1 = vcmask 654336  }
  0x10   :  { %2703 = vmatprep.subr.bf16.mxu0 %v3347_v1  ;;  %2723 = vmatprep.subr.bf16.mxu1 %v3347_v1  ;;  %v3190_v2 = vld [vmem:[%s4204_s1 + $0x40] sm:$0xff]   ;;  %v3192_v4 = vld [vmem:[%s4204_s1 + $0x48] sm:$0xff]   ;;  %v3194_v6 = vld [vmem:[%s4204_s1 + $0x50] sm:$0xff]   ;;  %vm2181_vm2 = vcmask 1044480   ;;  %vm3350_vm3 = vmmov 1   ;;  %vm2177_vm5 = vcmask 367616  }
  0x11   :  { %2704 = vmatpush3.bf16.msra.mxu0 %v3189_v0  ;;  %2719 = vmatprep.mubr.msk.bf16.mxu0 %vm3348_vm0, %v3347_v1  ;;  %v3195_v7 = vld [vmem:[%s4204_s1 + $0x18] sm:$0xff]   ;;  %v3197_v9 = vld [vmem:[%s4204_s1 + $0x20] sm:$0xff]   ;;  %v3199_v11 = vld [vmem:[%s4204_s1 + $0x28] sm:$0xff]   ;;  %vm2256_vm6 = vcmask 361472   ;;  %s46_s12 = sld [smem:[#allocation2]]  ;;  %vm2276_vm7 = vcmask 1024  }
  0x12   :  { %2724 = vmatpush3.bf16.msra.mxu1 %v3190_v2  ;;  %2705 = vmatprep.subr.bf16.mxu0 %v3347_v1  ;;  %v3196_v8 = vld [vmem:[%s4204_s1 + $0x58] sm:$0xff]   ;;  %v3198_v10 = vld [vmem:[%s4204_s1 + $0x60] sm:$0xff]   ;;  %v3200_v12 = vld [vmem:[%s4204_s1 + $0x68] sm:$0xff]  }
  0x13   :  { %2725 = vmatprep.subr.bf16.mxu1 %v3347_v1  ;;  %2739 = vmatprep.mubr.msk.bf16.mxu1 %vm3348_vm0, %v3347_v1  ;;  %v3201_v13 = vld [vmem:[%s4204_s1 + $0x30] sm:$0xff]   ;;  %v3203_v15 = vld [vmem:[%s4204_s1 + $0x38] sm:$0xff]   ;;  %v3473_v17 = vld [vmem:[%s4203_s0] sm:$0x3] }
  0x14   :  { %v3202_v14 = vld [vmem:[%s4204_s1 + $0x70] sm:$0xff]   ;;  %v3204_v16 = vld [vmem:[%s4204_s1 + $0x78] sm:$0xff]   ;;  %v3479_v18 = vld [vmem:[%s4203_s0 + $0x2] sm:$0x3]  ;;  %v3484_v19 = vpack.c.bf16 %v3473_v17, %v3473_v17  ;;  %v189_v57 = vmul.f32 %v3473_v17, %v3473_v17 }
  0x15   :  { %2706 = vmatpush3.bf16.msra.mxu0 %v3191_v3  ;;  %v241_v20 = vpack.c.bf16 %v3479_v18, %v3479_v18  ;;  %v3491_v21 = vld [vmem:[%s4206_s3 + $0x40] sm:$0xff]   ;;  %v3503_v23 = vld [vmem:[%s4206_s3 + $0x48] sm:$0xff]   ;;  %v3207_v25 = vld [vmem:[%s4207_s4 + $0x50] sm:$0xff]   ;;  %v508_v58 = vmul.f32 %v3479_v18, %v3479_v18 }
  0x16   :  { %2726 = vmatpush3.bf16.msra.mxu1 %v3192_v4  ;;  %2707 = vmatprep.subr.bf16.mxu0 %v3347_v1  ;;  %v3205_v22 = vld [vmem:[%s4207_s4 + $0x40] sm:$0xff]   ;;  %v3206_v24 = vld [vmem:[%s4207_s4 + $0x48] sm:$0xff]   ;;  %v3521_v26 = vld [vmem:[%s4206_s3 + $0x50] sm:$0xff]   ;;  %v190_v59 = vpack.c.bf16 %v189_v57, %v189_v57 }
  0x17   :  { %2727 = vmatprep.subr.bf16.mxu1 %v3347_v1  ;;  %v3528_v27 = vld [vmem:[%s4206_s3 + $0x58] sm:$0xff]   ;;  %v3539_v29 = vld [vmem:[%s4206_s3 + $0x60] sm:$0xff]   ;;  %v3550_v31 = vld [vmem:[%s4206_s3 + $0x68] sm:$0xff]   ;;  %v509_v60 = vpack.c.bf16 %v508_v58, %v508_v58 }
  0x18   :  { %v3208_v28 = vld [vmem:[%s4207_s4 + $0x58] sm:$0xff]   ;;  %v3209_v30 = vld [vmem:[%s4207_s4 + $0x60] sm:$0xff]   ;;  %v3210_v32 = vld [vmem:[%s4207_s4 + $0x68] sm:$0xff]  }
  0x19   :  { %2708 = vmatpush3.bf16.msra.mxu0 %v3193_v5  ;;  %v3561_v33 = vld [vmem:[%s4206_s3 + $0x70] sm:$0xff]   ;;  %v3212_v35 = vld [vmem:[%s4207_s4 + $0x78] sm:$0xff]   ;;  %v3214_v36 = vld [vmem:[%s4206_s3] sm:$0xff]  }
  0x1a   :  { %2728 = vmatpush3.bf16.msra.mxu1 %v3194_v6  ;;  %2709 = vmatprep.subr.bf16.mxu0 %v3347_v1  ;;  %v3211_v34 = vld [vmem:[%s4207_s4 + $0x70] sm:$0xff]   ;;  %v3216_v37 = vld [vmem:[%s4206_s3 + $0x8] sm:$0xff]   ;;  %v3220_v39 = vld [vmem:[%s4206_s3 + $0x18] sm:$0xff]  }
  0x1b   :  { %2729 = vmatprep.subr.bf16.mxu1 %v3347_v1  ;;  %v3218_v38 = vld [vmem:[%s4206_s3 + $0x10] sm:$0xff]   ;;  %v3222_v40 = vld [vmem:[%s4206_s3 + $0x20] sm:$0xff]   ;;  %v3224_v41 = vld [vmem:[%s4206_s3 + $0x28] sm:$0xff]  }
  0x1c   :  { %v3226_v42 = vld [vmem:[%s4206_s3 + $0x30] sm:$0xff]   ;;  %v3227_v43 = vld [vmem:[%s4206_s3 + $0x78] sm:$0xff]   ;;  %v3229_v61 = vld [vmem:[%s4207_s4] sm:$0xff]  }
  0x1d   :  { %2710 = vmatpush3.bf16.msra.mxu0 %v3195_v7  ;;  %v3228_v44 = vld [vmem:[%s4206_s3 + $0x38] sm:$0xff]   ;;  %v3230_v62 = vld [vmem:[%s4207_s4 + $0x8] sm:$0xff]   ;;  %v3231_v63 = vld [vmem:[%s4207_s4 + $0x10] sm:$0xff]  }
  0x1e   :  { %2730 = vmatpush3.bf16.msra.mxu1 %v3196_v8  ;;  %2711 = vmatprep.subr.bf16.mxu0 %v3347_v1  ;;  %v3232_v0 = vld [vmem:[%s4207_s4 + $0x18] sm:$0xff]   ;;  %v3233_v2 = vld [vmem:[%s4207_s4 + $0x20] sm:$0xff]   ;;  %v3234_v3 = vld [vmem:[%s4207_s4 + $0x28] sm:$0xff]  }
  0x1f   :  { %2731 = vmatprep.subr.bf16.mxu1 %v3347_v1  ;;  %v3235_v4 = vld [vmem:[%s4207_s4 + $0x30] sm:$0xff]   ;;  %v3236_v5 = vld [vmem:[%s4207_s4 + $0x38] sm:$0xff]   ;;  %v3237_v6 = vld [vmem:[%s4204_s1 + $0x80] sm:$0xff]  }
  0x20   :  { %v3238_v7 = vld [vmem:[%s4204_s1 + $0x88] sm:$0xff]   ;;  %v3239_v8 = vld [vmem:[%s4204_s1 + $0x90] sm:$0xff]   ;;  %v3272_v57 = vld [vmem:[%s4204_s1 + $0x118] sm:$0xff]  }
  0x21   :  { %2712 = vmatpush3.bf16.msra.mxu0 %v3197_v9  ;;  %v3240_v9 = vld [vmem:[%s4204_s1 + $0x98] sm:$0xff]   ;;  %v3273_v58 = vld [vmem:[%s4204_s1 + $0x120] sm:$0xff]   ;;  %vm3182_vm4 = vmpackc.low %vm2181_vm2, %vm3350_vm3 }
  0x22   :  { %2732 = vmatpush3.bf16.msra.mxu1 %v3198_v10  ;;  %2713 = vmatprep.subr.bf16.mxu0 %v3347_v1  ;;  %v3241_v10 = vld [vmem:[%s4204_s1 + $0xa0] sm:$0xff]  }
  0x23   :  { %2733 = vmatprep.subr.bf16.mxu1 %v3347_v1 }
  0x25   :  { %2714 = vmatpush3.bf16.msra.mxu0 %v3199_v11 }
  0x26   :  { %2734 = vmatpush3.bf16.msra.mxu1 %v3200_v12  ;;  %2715 = vmatprep.subr.bf16.mxu0 %v3347_v1 }
  0x27   :  { %2735 = vmatprep.subr.bf16.mxu1 %v3347_v1 }
  0x29   :  { %2716 = vmatpush3.bf16.msra.mxu0 %v3201_v13 }
  0x2a   :  { %2736 = vmatpush3.bf16.msra.mxu1 %v3202_v14  ;;  %2717 = vmatprep.subr.bf16.mxu0 %v3347_v1 }
  0x2b   :  { %2737 = vmatprep.subr.bf16.mxu1 %v3347_v1 }
  0x2d   :  { %2718 = vmatpush3.bf16.msra.mxu0 %v3203_v15  ;;  %v3242_v15 = vld [vmem:[%s4204_s1 + $0xa8] sm:$0xff]  }
  0x2e   :  { %2738 = vmatpush3.bf16.msra.mxu1 %v3204_v16  ;;  %2743 = vmatprep.subr.bf16.mxu0 %v3347_v1  ;;  %v3243_v16 = vld [vmem:[%s4204_s1 + $0xb0] sm:$0xff]  }
  0x2f   :  { %2763 = vmatprep.subr.bf16.mxu1 %v3347_v1 }
  0x30   :  { %2720 = vmatmul.mubr.bf16.vlgmr.msra.gmra.mrb[0].mxu0 %v3484_v19 }
  0x31   :  { %2740 = vmatmul.mubr.bf16.vlgmr.msra.gmra.mrb[0].mxu1 %v241_v20  ;;  %2744 = vmatpush3.bf16.msra.mxu0 %v3491_v21 }
  0x32   :  { %2764 = vmatpush3.bf16.msra.mxu1 %v3205_v22  ;;  %2779 = vmatprep.mubr.msk.bf16.mxu1 %vm3348_vm0, %v3347_v1  ;;  %v3247_v22 = vld [vmem:[%s4207_s4 + $0x90] sm:$0xff]  }
  0x33   :  { %2765 = vmatprep.subr.bf16.mxu1 %v3347_v1  ;;  %2745 = vmatprep.subr.bf16.mxu0 %v3347_v1 }
  0x34   :  { %2759 = vmatprep.mubr.msk.bf16.mxu0 %vm3348_vm0, %v3347_v1 }
  0x35   :  { %2746 = vmatpush3.bf16.msra.mxu0 %v3503_v23 }
  0x36   :  { %2766 = vmatpush3.bf16.msra.mxu1 %v3206_v24  ;;  %2747 = vmatprep.subr.bf16.mxu0 %v3347_v1  ;;  %v3249_v24 = vld [vmem:[%s4207_s4 + $0xa0] sm:$0xff]  }
  0x37   :  { %2767 = vmatprep.subr.bf16.mxu1 %v3347_v1 }
  0x39   :  { %2748 = vmatpush3.bf16.msra.mxu0 %v3521_v26 }
  0x3a   :  { %2768 = vmatpush3.bf16.msra.mxu1 %v3207_v25  ;;  %2749 = vmatprep.subr.bf16.mxu0 %v3347_v1  ;;  %v3250_v25 = vld [vmem:[%s4207_s4 + $0xa8] sm:$0xff]  }
  0x3b   :  { %2769 = vmatprep.subr.bf16.mxu1 %v3347_v1 }
  0x3d   :  { %2750 = vmatpush3.bf16.msra.mxu0 %v3528_v27 }
  0x3e   :  { %2770 = vmatpush3.bf16.msra.mxu1 %v3208_v28  ;;  %2751 = vmatprep.subr.bf16.mxu0 %v3347_v1  ;;  %v3253_v28 = vld [vmem:[%s4204_s1 + $0xc0] sm:$0xff]  }
  0x3f   :  { %2771 = vmatprep.subr.bf16.mxu1 %v3347_v1 }
  0x41   :  { %2752 = vmatpush3.bf16.msra.mxu0 %v3539_v29 }
  0x42   :  { %2772 = vmatpush3.bf16.msra.mxu1 %v3209_v30  ;;  %2753 = vmatprep.subr.bf16.mxu0 %v3347_v1  ;;  %v3255_v30 = vld [vmem:[%s4204_s1 + $0xd0] sm:$0xff]  }
  0x43   :  { %2773 = vmatprep.subr.bf16.mxu1 %v3347_v1 }
  0x45   :  { %2754 = vmatpush3.bf16.msra.mxu0 %v3550_v31 }
  0x46   :  { %2774 = vmatpush3.bf16.msra.mxu1 %v3210_v32  ;;  %2755 = vmatprep.subr.bf16.mxu0 %v3347_v1  ;;  %v3257_v32 = vld [vmem:[%s4204_s1 + $0xe0] sm:$0xff]  }
  0x47   :  { %2775 = vmatprep.subr.bf16.mxu1 %v3347_v1 }
  0x49   :  { %2756 = vmatpush3.bf16.msra.mxu0 %v3561_v33 }
  0x4a   :  { %2776 = vmatpush3.bf16.msra.mxu1 %v3211_v34  ;;  %2757 = vmatprep.subr.bf16.mxu0 %v3347_v1  ;;  %v3259_v34 = vld [vmem:[%s4204_s1 + $0xf0] sm:$0xff]  }
  0x4b   :  { %2777 = vmatprep.subr.bf16.mxu1 %v3347_v1 }
  0x4d   :  { %2758 = vmatpush3.bf16.msra.mxu0 %v3227_v43 }
  0x4e   :  { %2778 = vmatpush3.bf16.msra.mxu1 %v3212_v35  ;;  %2783 = vmatprep.subr.bf16.mxu0 %v3347_v1  ;;  %v3793_v35 = vld [vmem:[%s4206_s3 + $0x80] sm:$0xff]  }
  0x4f   :  { %2803 = vmatprep.subr.bf16.mxu1 %v3347_v1 }
  0x51   :  { %2780 = vmatmul.mubr.bf16.vlgmr.msra.gmra.mrb[4].mxu1 %v241_v20  ;;  %v3245_v20 = vld [vmem:[%s4207_s4 + $0x80] sm:$0xff]  }
  0x52   :  { %2804 = vmatpush3.bf16.msra.mxu1 %v3214_v36  ;;  %2819 = vmatprep.mubr.msk.bf16.mxu1 %vm3348_vm0, %v3347_v1 }
  0x53   :  { %2805 = vmatprep.subr.bf16.mxu1 %v3347_v1 }
  0x56   :  { %2806 = vmatpush3.bf16.msra.mxu1 %v3216_v37 }
  0x57   :  { %2807 = vmatprep.subr.bf16.mxu1 %v3347_v1 }
  0x5a   :  { %2808 = vmatpush3.bf16.msra.mxu1 %v3218_v38 }
  0x5b   :  { %2809 = vmatprep.subr.bf16.mxu1 %v3347_v1 }
  0x5e   :  { %2810 = vmatpush3.bf16.msra.mxu1 %v3220_v39 }
  0x5f   :  { %2811 = vmatprep.subr.bf16.mxu1 %v3347_v1 }
  0x62   :  { %2812 = vmatpush3.bf16.msra.mxu1 %v3222_v40 }
  0x63   :  { %2813 = vmatprep.subr.bf16.mxu1 %v3347_v1 }
  0x66   :  { %2814 = vmatpush3.bf16.msra.mxu1 %v3224_v41 }
  0x67   :  { %2815 = vmatprep.subr.bf16.mxu1 %v3347_v1 }
  0x6a   :  { %2816 = vmatpush3.bf16.msra.mxu1 %v3226_v42 }
  0x6b   :  { %2817 = vmatprep.subr.bf16.mxu1 %v3347_v1 }
  0x6e   :  { %2818 = vmatpush3.bf16.msra.mxu1 %v3228_v44 }
  0x6f   :  { %2843 = vmatprep.subr.bf16.mxu1 %v3347_v1 }
 0x103   :  { %v181_v45 = vpop.f32.mrb[0].mxu0 }
 0x104   :  { %v187_v46 = vmul.f32 %v181_v45, %v3473_v17  ;;  %v324_v47 = vpop.f32.mrb[0].mxu1  ;;  %v2721_v48 = vpop.f32.mrb[1].mxu0  ;;  %v3244_v17 = vld [vmem:[%s4204_s1 + $0xb8] sm:$0xff]   ;;  %v3845_v45 = vld [vmem:[%s4206_s3 + $0xa0] sm:$0xff]  }
 0x105   :  { %v330_v49 = vmul.f32 %v324_v47, %v3479_v18  ;;  %v2741_v50 = vpop.f32.mrb[1].mxu1  ;;  %v184_v51 = vpop.f32.mrb[2].mxu0  ;;  %v3721_v18 = vld [vmem:[%s4203_s0 + $0x4] sm:$0x3]  ;;  %v3264_v47 = vld [vmem:[%s4207_s4 + $0xd8] sm:$0xff]   ;;  %v3863_v48 = vld [vmem:[%s4206_s3 + $0xb0] sm:$0xff]  }
 0x106   :  { %v188_v52 = vpack.c.bf16 %v187_v46, %v187_v46  ;;  %v327_v53 = vpop.f32.mrb[2].mxu1  ;;  %v2722_v54 = vpop.f32.mrb[3].mxu0  ;;  %v3852_v46 = vld [vmem:[%s4206_s3 + $0xa8] sm:$0xff]   ;;  %v3879_v51 = vld [vmem:[%s4206_s3 + $0xb8] sm:$0xff]  }
 0x107   :  { %v331_v55 = vpack.c.bf16 %v330_v49, %v330_v49  ;;  %v2742_v56 = vpop.f32.mrb[3].mxu1  ;;  %v3265_v49 = vld [vmem:[%s4207_s4 + $0xe0] sm:$0xff]   ;;  %v3266_v50 = vld [vmem:[%s4207_s4 + $0xe8] sm:$0xff]   ;;  %v3268_v53 = vld [vmem:[%s4207_s4 + $0xf8] sm:$0xff]  }
 0x108   :  { %2820 = vmatmul.mubr.bf16.vlgmr.msra.gmra.mrb[8].mxu1 %v188_v52  ;;  %v3267_v52 = vld [vmem:[%s4207_s4 + $0xf0] sm:$0xff]   ;;  %v3269_v54 = vld [vmem:[%s4204_s1 + $0x100] sm:$0xff]  }
 0x109   :  { %2760 = vmatmul.mubr.bf16.vlgmr.msra.gmra.mrb[4].mxu0 %v331_v55  ;;  %2844 = vmatpush3.bf16.msra.mxu1 %v3214_v36  ;;  %v3260_v36 = vld [vmem:[%s4204_s1 + $0xf8] sm:$0xff]   ;;  %v3270_v55 = vld [vmem:[%s4204_s1 + $0x108] sm:$0xff]   ;;  %v3271_v56 = vld [vmem:[%s4204_s1 + $0x110] sm:$0xff]  }
 0x10a   :  { %2784 = vmatpush3.bf16.msra.mxu0 %v3491_v21  ;;  %2845 = vmatprep.subr.bf16.mxu1 %v3347_v1  ;;  %v3246_v21 = vld [vmem:[%s4207_s4 + $0x88] sm:$0xff]  }
 0x10b   :  { %2785 = vmatprep.subr.bf16.mxu0 %v3347_v1  ;;  %2799 = vmatprep.mubr.msk.bf16.mxu0 %vm3348_vm0, %v3347_v1 }
 0x10c   :  { %2859 = vmatprep.mubr.msk.bf16.mxu1 %vm3348_vm0, %v3347_v1 }
 0x10d   :  { %2846 = vmatpush3.bf16.msra.mxu1 %v3216_v37  ;;  %v3802_v37 = vld [vmem:[%s4203_s0 + $0x6] sm:$0x3] }
 0x10e   :  { %2786 = vmatpush3.bf16.msra.mxu0 %v3503_v23  ;;  %2847 = vmatprep.subr.bf16.mxu1 %v3347_v1  ;;  %v3248_v23 = vld [vmem:[%s4207_s4 + $0x98] sm:$0xff]  }
 0x10f   :  { %2787 = vmatprep.subr.bf16.mxu0 %v3347_v1 }
 0x111   :  { %2848 = vmatpush3.bf16.msra.mxu1 %v3218_v38  ;;  %v3808_v38 = vld [vmem:[%s4206_s3 + $0x88] sm:$0xff]  }
 0x112   :  { %2788 = vmatpush3.bf16.msra.mxu0 %v3521_v26  ;;  %2849 = vmatprep.subr.bf16.mxu1 %v3347_v1  ;;  %v3251_v26 = vld [vmem:[%s4207_s4 + $0xb0] sm:$0xff]  }
 0x113   :  { %2789 = vmatprep.subr.bf16.mxu0 %v3347_v1 }
 0x115   :  { %2850 = vmatpush3.bf16.msra.mxu1 %v3220_v39  ;;  %v1178_v39 = vpack.c.bf16 %v3802_v37, %v3802_v37 }
 0x116   :  { %2790 = vmatpush3.bf16.msra.mxu0 %v3528_v27  ;;  %2851 = vmatprep.subr.bf16.mxu1 %v3347_v1  ;;  %v3252_v27 = vld [vmem:[%s4207_s4 + $0xb8] sm:$0xff]  }
 0x117   :  { %2791 = vmatprep.subr.bf16.mxu0 %v3347_v1 }
 0x119   :  { %2852 = vmatpush3.bf16.msra.mxu1 %v3222_v40  ;;  %v3261_v40 = vld [vmem:[%s4207_s4 + $0xc0] sm:$0xff]  }
 0x11a   :  { %2792 = vmatpush3.bf16.msra.mxu0 %v3539_v29  ;;  %2853 = vmatprep.subr.bf16.mxu1 %v3347_v1  ;;  %v3254_v29 = vld [vmem:[%s4204_s1 + $0xc8] sm:$0xff]  }
 0x11b   :  { %2793 = vmatprep.subr.bf16.mxu0 %v3347_v1 }
 0x11d   :  { %2854 = vmatpush3.bf16.msra.mxu1 %v3224_v41  ;;  %v3821_v41 = vld [vmem:[%s4206_s3 + $0x90] sm:$0xff]  }
 0x11e   :  { %2794 = vmatpush3.bf16.msra.mxu0 %v3550_v31  ;;  %2855 = vmatprep.subr.bf16.mxu1 %v3347_v1  ;;  %v3256_v31 = vld [vmem:[%s4204_s1 + $0xd8] sm:$0xff]  }
 0x11f   :  { %2795 = vmatprep.subr.bf16.mxu0 %v3347_v1 }
 0x121   :  { %2856 = vmatpush3.bf16.msra.mxu1 %v3226_v42  ;;  %v3262_v42 = vld [vmem:[%s4207_s4 + $0xc8] sm:$0xff]  }
 0x122   :  { %2796 = vmatpush3.bf16.msra.mxu0 %v3561_v33  ;;  %2857 = vmatprep.subr.bf16.mxu1 %v3347_v1  ;;  %v3258_v33 = vld [vmem:[%s4204_s1 + $0xe8] sm:$0xff]  }
 0x123   :  { %2797 = vmatprep.subr.bf16.mxu0 %v3347_v1 }
 0x124   :  { %v3704_v11 = vpop.f32.mrb[4].mxu1 }
 0x125   :  { %2858 = vmatpush3.bf16.msra.mxu1 %v3228_v44  ;;  %v2781_v12 = vpop.f32.mrb[5].mxu1  ;;  %v3263_v44 = vld [vmem:[%s4207_s4 + $0xd0] sm:$0xff]  }
 0x126   :  { %2798 = vmatpush3.bf16.msra.mxu0 %v3227_v43  ;;  %2883 = vmatprep.subr.bf16.mxu1 %v3347_v1  ;;  %v505_v13 = vpop.f32.mrb[6].mxu1  ;;  %v3833_v43 = vld [vmem:[%s4206_s3 + $0x98] sm:$0xff]   ;;  %v3278_v12 = vld [vmem:[%s4207_s4 + $0x108] sm:$0xff]  }
 0x127   :  { %2823 = vmatprep.subr.bf16.mxu0 %v3347_v1  ;;  %v2782_v14 = vpop.f32.mrb[7].mxu1  ;;  %v3279_v13 = vld [vmem:[%s4207_s4 + $0x110] sm:$0xff]  }
 0x128   :  { %2860 = vmatmul.mubr.bf16.vlgmr.msra.gmra.mrb[12].mxu1 %v190_v59  ;;  %v3274_v59 = vld [vmem:[%s4204_s1 + $0x128] sm:$0xff]   ;;  %v3280_v14 = vld [vmem:[%s4207_s4 + $0x118] sm:$0xff]  }
 0x129   :  { %2800 = vmatmul.mubr.bf16.vlgmr.msra.gmra.mrb[8].mxu0 %v509_v60  ;;  %2899 = vmatprep.mubr.msk.bf16.mxu1 %vm3348_vm0, %v3347_v1 }
 0x12a   :  { %2824 = vmatpush3.bf16.msra.mxu0 %v3229_v61  ;;  %2839 = vmatprep.mubr.msk.bf16.mxu0 %vm3348_vm0, %v3347_v1 }
 0x12b   :  { %2825 = vmatprep.subr.bf16.mxu0 %v3347_v1  ;;  %2884 = vmatpush3.bf16.msra.mxu1 %v3793_v35 }
 0x12c   :  { %2885 = vmatprep.subr.bf16.mxu1 %v3347_v1 }
 0x12e   :  { %2826 = vmatpush3.bf16.msra.mxu0 %v3230_v62 }
 0x12f   :  { %2827 = vmatprep.subr.bf16.mxu0 %v3347_v1  ;;  %2886 = vmatpush3.bf16.msra.mxu1 %v3808_v38 }
 0x130   :  { %2887 = vmatprep.subr.bf16.mxu1 %v3347_v1 }
 0x132   :  { %2828 = vmatpush3.bf16.msra.mxu0 %v3231_v63 }
 0x133   :  { %2829 = vmatprep.subr.bf16.mxu0 %v3347_v1  ;;  %2888 = vmatpush3.bf16.msra.mxu1 %v3821_v41 }
 0x134   :  { %2889 = vmatprep.subr.bf16.mxu1 %v3347_v1 }
 0x136   :  { %2830 = vmatpush3.bf16.msra.mxu0 %v3232_v0 }
 0x137   :  { %2831 = vmatprep.subr.bf16.mxu0 %v3347_v1  ;;  %2890 = vmatpush3.bf16.msra.mxu1 %v3833_v43 }
 0x138   :  { %2891 = vmatprep.subr.bf16.mxu1 %v3347_v1 }
 0x13a   :  { %2832 = vmatpush3.bf16.msra.mxu0 %v3233_v2 }
 0x13b   :  { %2833 = vmatprep.subr.bf16.mxu0 %v3347_v1  ;;  %2892 = vmatpush3.bf16.msra.mxu1 %v3845_v45 }
 0x13c   :  { %2893 = vmatprep.subr.bf16.mxu1 %v3347_v1 }
 0x13e   :  { %2834 = vmatpush3.bf16.msra.mxu0 %v3234_v3 }
 0x13f   :  { %2835 = vmatprep.subr.bf16.mxu0 %v3347_v1  ;;  %2894 = vmatpush3.bf16.msra.mxu1 %v3852_v46 }
 0x140   :  { %2895 = vmatprep.subr.bf16.mxu1 %v3347_v1 }
 0x142   :  { %2836 = vmatpush3.bf16.msra.mxu0 %v3235_v4  ;;  %v3275_v4 = vld [vmem:[%s4204_s1 + $0x130] sm:$0xff]  }
 0x143   :  { %2837 = vmatprep.subr.bf16.mxu0 %v3347_v1  ;;  %2896 = vmatpush3.bf16.msra.mxu1 %v3863_v48 }
 0x144   :  { %2897 = vmatprep.subr.bf16.mxu1 %v3347_v1 }
 0x146   :  { %2838 = vmatpush3.bf16.msra.mxu0 %v3236_v5 }
 0x147   :  { %2863 = vmatprep.subr.bf16.mxu0 %v3347_v1  ;;  %2898 = vmatpush3.bf16.msra.mxu1 %v3879_v51 }
 0x148   :  { %2923 = vmatprep.subr.bf16.mxu1 %v3347_v1 }
 0x149   :  { %2840 = vmatmul.mubr.bf16.vlgmr.msra.gmra.mrb[12].mxu0 %v3484_v19  ;;  %v816_v19 = vpack.c.bf16 %v3721_v18, %v3721_v18 }
 0x14a   :  { %2864 = vmatpush3.bf16.msra.mxu0 %v3237_v6  ;;  %2879 = vmatprep.mubr.msk.bf16.mxu0 %vm3348_vm0, %v3347_v1 }
 0x14b   :  { %2865 = vmatprep.subr.bf16.mxu0 %v3347_v1 }
 0x14e   :  { %2866 = vmatpush3.bf16.msra.mxu0 %v3238_v7  ;;  %v3276_v7 = vld [vmem:[%s4204_s1 + $0x138] sm:$0xff]  }
 0x14f   :  { %2867 = vmatprep.subr.bf16.mxu0 %v3347_v1 }
 0x152   :  { %2868 = vmatpush3.bf16.msra.mxu0 %v3239_v8  ;;  %v3929_v8 = vld [vmem:[%s4203_s0 + $0x8] sm:$0x3] }
 0x153   :  { %2869 = vmatprep.subr.bf16.mxu0 %v3347_v1 }
 0x156   :  { %2870 = vmatpush3.bf16.msra.mxu0 %v3240_v9  ;;  %v1540_v9 = vpack.c.bf16 %v3929_v8, %v3929_v8 }
 0x157   :  { %2871 = vmatprep.subr.bf16.mxu0 %v3347_v1 }
 0x15a   :  { %2872 = vmatpush3.bf16.msra.mxu0 %v3241_v10  ;;  %v3277_v10 = vld [vmem:[%s4207_s4 + $0x100] sm:$0xff]  }
 0x15b   :  { %2873 = vmatprep.subr.bf16.mxu0 %v3347_v1 }
 0x15e   :  { %2874 = vmatpush3.bf16.msra.mxu0 %v3242_v15  ;;  %v3281_v15 = vld [vmem:[%s4207_s4 + $0x120] sm:$0xff]  }
 0x15f   :  { %2875 = vmatprep.subr.bf16.mxu0 %v3347_v1 }
 0x162   :  { %2876 = vmatpush3.bf16.msra.mxu0 %v3243_v16  ;;  %v3282_v16 = vld [vmem:[%s4207_s4 + $0x128] sm:$0xff]  }
 0x163   :  { %2877 = vmatprep.subr.bf16.mxu0 %v3347_v1 }
 0x166   :  { %2878 = vmatpush3.bf16.msra.mxu0 %v3244_v17 }
 0x167   :  { %2903 = vmatprep.subr.bf16.mxu0 %v3347_v1 }
 0x169   :  { %2880 = vmatmul.mubr.bf16.vlgmr.msra.gmra.mrb[16].mxu0 %v816_v19 }
 0x16a   :  { %2904 = vmatpush3.bf16.msra.mxu0 %v3245_v20  ;;  %2919 = vmatprep.mubr.msk.bf16.mxu0 %vm3348_vm0, %v3347_v1 }
 0x16b   :  { %2905 = vmatprep.subr.bf16.mxu0 %v3347_v1 }
 0x16e   :  { %2906 = vmatpush3.bf16.msra.mxu0 %v3246_v21 }
 0x16f   :  { %2907 = vmatprep.subr.bf16.mxu0 %v3347_v1 }
 0x172   :  { %2908 = vmatpush3.bf16.msra.mxu0 %v3247_v22 }
 0x173   :  { %2909 = vmatprep.subr.bf16.mxu0 %v3347_v1 }
 0x176   :  { %2910 = vmatpush3.bf16.msra.mxu0 %v3248_v23 }
 0x177   :  { %2911 = vmatprep.subr.bf16.mxu0 %v3347_v1 }
 0x17a   :  { %2912 = vmatpush3.bf16.msra.mxu0 %v3249_v24 }
 0x17b   :  { %2913 = vmatprep.subr.bf16.mxu0 %v3347_v1 }
 0x17e   :  { %2914 = vmatpush3.bf16.msra.mxu0 %v3250_v25  ;;  %v3283_v25 = vld [vmem:[%s4207_s4 + $0x130] sm:$0xff]  }
 0x17f   :  { %2915 = vmatprep.subr.bf16.mxu0 %v3347_v1 }
 0x182   :  { %2916 = vmatpush3.bf16.msra.mxu0 %v3251_v26 }
 0x183   :  { %2917 = vmatprep.subr.bf16.mxu0 %v3347_v1 }
 0x186   :  { %2918 = vmatpush3.bf16.msra.mxu0 %v3252_v27 }
 0x187   :  { %2943 = vmatprep.subr.bf16.mxu0 %v3347_v1 }
 0x189   :  { %2920 = vmatmul.mubr.bf16.vlgmr.msra.gmra.mrb[20].mxu0 %v816_v19 }
 0x18a   :  { %2944 = vmatpush3.bf16.msra.mxu0 %v3253_v28  ;;  %2959 = vmatprep.mubr.msk.bf16.mxu0 %vm3348_vm0, %v3347_v1  ;;  %v3284_v28 = vld [vmem:[%s4207_s4 + $0x138] sm:$0xff]  }
 0x18b   :  { %2945 = vmatprep.subr.bf16.mxu0 %v3347_v1 }
 0x18e   :  { %2946 = vmatpush3.bf16.msra.mxu0 %v3254_v29  ;;  %v3285_v29 = vld [vmem:[%s4205_s2] sm:$0xff]  }
 0x18f   :  { %2947 = vmatprep.subr.bf16.mxu0 %v3347_v1 }
 0x192   :  { %2948 = vmatpush3.bf16.msra.mxu0 %v3255_v30  ;;  %v3286_v30 = vld [vmem:[%s4205_s2 + $0x8] sm:$0xff]  }
 0x193   :  { %2949 = vmatprep.subr.bf16.mxu0 %v3347_v1 }
 0x196   :  { %2950 = vmatpush3.bf16.msra.mxu0 %v3256_v31  ;;  %v3287_v31 = vld [vmem:[%s4205_s2 + $0x10] sm:$0xff]  }
 0x197   :  { %2951 = vmatprep.subr.bf16.mxu0 %v3347_v1 }
 0x19a   :  { %2952 = vmatpush3.bf16.msra.mxu0 %v3257_v32  ;;  %v3288_v32 = vld [vmem:[%s4205_s2 + $0x18] sm:$0xff]  }
 0x19b   :  { %2953 = vmatprep.subr.bf16.mxu0 %v3347_v1 }
 0x19e   :  { %2954 = vmatpush3.bf16.msra.mxu0 %v3258_v33  ;;  %v3289_v33 = vld [vmem:[%s4205_s2 + $0x20] sm:$0xff]  }
 0x19f   :  { %2955 = vmatprep.subr.bf16.mxu0 %v3347_v1 }
 0x1a2   :  { %2956 = vmatpush3.bf16.msra.mxu0 %v3259_v34  ;;  %v3994_v34 = vld [vmem:[%s4203_s0 + $0xa] sm:$0x3] }
 0x1a3   :  { %2957 = vmatprep.subr.bf16.mxu0 %v3347_v1 }
 0x1a6   :  { %2958 = vmatpush3.bf16.msra.mxu0 %v3260_v36  ;;  %v1883_v36 = vpack.c.bf16 %v3994_v34, %v3994_v34 }
 0x1a7   :  { %2983 = vmatprep.subr.bf16.mxu0 %v3347_v1 }
 0x1a9   :  { %2960 = vmatmul.mubr.bf16.vlgmr.msra.gmra.mrb[24].mxu0 %v1178_v39 }
 0x1aa   :  { %2984 = vmatpush3.bf16.msra.mxu0 %v3261_v40  ;;  %2999 = vmatprep.mubr.msk.bf16.mxu0 %vm3348_vm0, %v3347_v1 }
 0x1ab   :  { %2985 = vmatprep.subr.bf16.mxu0 %v3347_v1 }
 0x1ae   :  { %2986 = vmatpush3.bf16.msra.mxu0 %v3262_v42 }
 0x1af   :  { %2987 = vmatprep.subr.bf16.mxu0 %v3347_v1 }
 0x1b2   :  { %2988 = vmatpush3.bf16.msra.mxu0 %v3263_v44 }
 0x1b3   :  { %2989 = vmatprep.subr.bf16.mxu0 %v3347_v1 }
 0x1b6   :  { %2990 = vmatpush3.bf16.msra.mxu0 %v3264_v47 }
 0x1b7   :  { %2991 = vmatprep.subr.bf16.mxu0 %v3347_v1 }
 0x1ba   :  { %2992 = vmatpush3.bf16.msra.mxu0 %v3265_v49  ;;  %v3292_v49 = vld [vmem:[%s4207_s4 + $0x148] sm:$0xff]  }
 0x1bb   :  { %2993 = vmatprep.subr.bf16.mxu0 %v3347_v1 }
 0x1be   :  { %2994 = vmatpush3.bf16.msra.mxu0 %v3266_v50 }
 0x1bf   :  { %2995 = vmatprep.subr.bf16.mxu0 %v3347_v1 }
 0x1c2   :  { %2996 = vmatpush3.bf16.msra.mxu0 %v3267_v52  ;;  %v3296_v52 = vld [vmem:[%s4207_s4 + $0x158] sm:$0xff]  }
 0x1c3   :  { %2997 = vmatprep.subr.bf16.mxu0 %v3347_v1 }
 0x1c6   :  { %2998 = vmatpush3.bf16.msra.mxu0 %v3268_v53  ;;  %v3298_v53 = vld [vmem:[%s4207_s4 + $0x160] sm:$0xff]  }
 0x1c7   :  { %3023 = vmatprep.subr.bf16.mxu0 %v3347_v1 }
 0x1c9   :  { %3000 = vmatmul.mubr.bf16.vlgmr.msra.gmra.mrb[28].mxu0 %v1178_v39  ;;  %v3290_v39 = vld [vmem:[%s4207_s4 + $0x140] sm:$0xff]  }
 0x1ca   :  { %3024 = vmatpush3.bf16.msra.mxu0 %v3269_v54  ;;  %3039 = vmatprep.mubr.msk.bf16.mxu0 %vm3348_vm0, %v3347_v1 }
 0x1cb   :  { %3025 = vmatprep.subr.bf16.mxu0 %v3347_v1 }
 0x1ce   :  { %3026 = vmatpush3.bf16.msra.mxu0 %v3270_v55 }
 0x1cf   :  { %3027 = vmatprep.subr.bf16.mxu0 %v3347_v1 }
 0x1d2   :  { %3028 = vmatpush3.bf16.msra.mxu0 %v3271_v56 }
 0x1d3   :  { %3029 = vmatprep.subr.bf16.mxu0 %v3347_v1 }
 0x1d6   :  { %3030 = vmatpush3.bf16.msra.mxu0 %v3272_v57 }
 0x1d7   :  { %3031 = vmatprep.subr.bf16.mxu0 %v3347_v1 }
 0x1da   :  { %3032 = vmatpush3.bf16.msra.mxu0 %v3273_v58 }
 0x1db   :  { %v632_v60 = vpop.f32.mrb[8].mxu1  ;;  %3033 = vmatprep.subr.bf16.mxu0 %v3347_v1 }
 0x1dc   :  { %v414_v61 = vpop.f32.mrb[4].mxu0  ;;  %v2821_v62 = vpop.f32.mrb[9].mxu1 }
 0x1dd   :  { %v3917_v63 = vadd.f32 %v632_v60, %v414_v61  ;;  %v2761_v0 = vpop.f32.mrb[5].mxu0  ;;  %v635_v2 = vpop.f32.mrb[10].mxu1  ;;  %v3307_v62 = vld [vmem:[%s4206_s3 + $0xe0] sm:$0xff]  }
 0x1de   :  { %3034 = vmatpush3.bf16.msra.mxu0 %v3274_v59  ;;  %v417_v3 = vpop.f32.mrb[6].mxu0  ;;  %v2822_v5 = vpop.f32.mrb[11].mxu1  ;;  %v3308_v0 = vld [vmem:[%s4206_s3 + $0xe8] sm:$0xff]   ;;  %v3309_v2 = vld [vmem:[%s4206_s3 + $0xf0] sm:$0xff]  }
 0x1df   :  { %v2762_v6 = vpop.f32.mrb[7].mxu0  ;;  %3035 = vmatprep.subr.bf16.mxu0 %v3347_v1  ;;  %v3310_v3 = vld [vmem:[%s4206_s3 + $0xf8] sm:$0xff]  }
 0x1e2   :  { %3036 = vmatpush3.bf16.msra.mxu0 %v3275_v4 }
 0x1e3   :  { %3037 = vmatprep.subr.bf16.mxu0 %v3347_v1 }
 0x1e6   :  { %3038 = vmatpush3.bf16.msra.mxu0 %v3276_v7 }
 0x1e7   :  { %3063 = vmatprep.subr.bf16.mxu0 %v3347_v1 }
 0x1e9   :  { %3040 = vmatmul.mubr.bf16.vlgmr.msra.gmra.mrb[32].mxu0 %v1540_v9 }
 0x1ea   :  { %3064 = vmatpush3.bf16.msra.mxu0 %v3277_v10  ;;  %3079 = vmatprep.mubr.msk.bf16.mxu0 %vm3348_vm0, %v3347_v1 }
 0x1eb   :  { %3065 = vmatprep.subr.bf16.mxu0 %v3347_v1 }
 0x1ee   :  { %3066 = vmatpush3.bf16.msra.mxu0 %v3278_v12  ;;  %v1445_v12 = vmul.f32 %v3802_v37, %v3802_v37 }
 0x1ef   :  { %3067 = vmatprep.subr.bf16.mxu0 %v3347_v1 }
 0x1f2   :  { %3068 = vmatpush3.bf16.msra.mxu0 %v3279_v13 }
 0x1f3   :  { %3069 = vmatprep.subr.bf16.mxu0 %v3347_v1 }
 0x1f6   :  { %3070 = vmatpush3.bf16.msra.mxu0 %v3280_v14 }
 0x1f7   :  { %3071 = vmatprep.subr.bf16.mxu0 %v3347_v1 }
 0x1fa   :  { %3072 = vmatpush3.bf16.msra.mxu0 %v3281_v15 }
 0x1fb   :  { %v760_v17 = vpop.f32.mrb[12].mxu1  ;;  %3073 = vmatprep.subr.bf16.mxu0 %v3347_v1 }
 0x1fc   :  { %v544_v19 = vpop.f32.mrb[8].mxu0  ;;  %v2861_v20 = vpop.f32.mrb[13].mxu1 }
 0x1fd   :  { %v2801_v21 = vpop.f32.mrb[9].mxu0  ;;  %v3960_v22 = vadd.f32 %v760_v17, %v544_v19  ;;  %v763_v23 = vpop.f32.mrb[14].mxu1  ;;  %v3311_v19 = vld [vmem:[%s4206_s3 + $0x100] sm:$0xff]  }
 0x1fe   :  { %v547_v24 = vpop.f32.mrb[10].mxu0  ;;  %3074 = vmatpush3.bf16.msra.mxu0 %v3282_v16  ;;  %v2862_v26 = vpop.f32.mrb[15].mxu1  ;;  %v1446_v16 = vpack.c.bf16 %v1445_v12, %v1445_v12  ;;  %v3313_v21 = vld [vmem:[%s4206_s3 + $0x110] sm:$0xff]   ;;  %v3314_v23 = vld [vmem:[%s4206_s3 + $0x118] sm:$0xff]  }
 0x1ff   :  { %v2802_v27 = vpop.f32.mrb[11].mxu0  ;;  %3075 = vmatprep.subr.bf16.mxu0 %v3347_v1  ;;  %v3315_v24 = vld [vmem:[%s4206_s3 + $0x120] sm:$0xff]   ;;  %v3317_v26 = vld [vmem:[%s4206_s3 + $0x130] sm:$0xff]  }
 0x200   :  { %v3318_v27 = vld [vmem:[%s4206_s3 + $0x138] sm:$0xff]  }
 0x202   :  { %3076 = vmatpush3.bf16.msra.mxu0 %v3283_v25  ;;  %v3316_v25 = vld [vmem:[%s4206_s3 + $0x128] sm:$0xff]  }
 0x203   :  { %3077 = vmatprep.subr.bf16.mxu0 %v3347_v1 }
 0x206   :  { %3078 = vmatpush3.bf16.msra.mxu0 %v3284_v28 }
 0x207   :  { %3103 = vmatprep.subr.bf16.mxu0 %v3347_v1 }
 0x209   :  { %3080 = vmatmul.mubr.bf16.vlgmr.msra.gmra.mrb[36].mxu0 %v1540_v9 }
 0x20a   :  { %3104 = vmatpush3.bf16.msra.mxu0 %v3285_v29  ;;  %3113 = vmatprep.mubr.msk.bf16.mxu0 %vm3348_vm0, %v3347_v1 }
 0x20b   :  { %3105 = vmatprep.subr.bf16.mxu0 %v3347_v1 }
 0x20e   :  { %3106 = vmatpush3.bf16.msra.mxu0 %v3286_v30 }
 0x20f   :  { %3107 = vmatprep.subr.bf16.mxu0 %v3347_v1 }
 0x212   :  { %3108 = vmatpush3.bf16.msra.mxu0 %v3287_v31 }
 0x213   :  { %3109 = vmatprep.subr.bf16.mxu0 %v3347_v1 }
 0x216   :  { %3110 = vmatpush3.bf16.msra.mxu0 %v3288_v32 }
 0x217   :  { %3111 = vmatprep.subr.bf16.mxu0 %v3347_v1 }
 0x21a   :  { %3112 = vmatpush3.bf16.msra.mxu0 %v3289_v33 }
 0x21b   :  { %3131 = vmatprep.subr.bf16.mxu0 %v3347_v1 }
 0x21c   :  { %v720_v40 = vpop.f32.mrb[12].mxu0 }
 0x21d   :  { %v721_v42 = vadd.f32 %v720_v40, %v3704_v11  ;;  %v2841_v44 = vpop.f32.mrb[13].mxu0  ;;  %3114 = vmatmul.mubr.msk.bf16.vlgmr.msra.gmra.mrb[40].mxu0 %vm1914_vm1, %v1883_v36  ;;  %v3294_v11 = vld [vmem:[%s4207_s4 + $0x150] sm:$0xff]  }
 0x21e   :  { %v723_v47 = vpop.f32.mrb[14].mxu0  ;;  %3132 = vmatpush3.bf16.msra.mxu0 %v3290_v39  ;;  %3141 = vmatprep.mubr.msk.bf16.mxu0 %vm3348_vm0, %v3347_v1 }
 0x21f   :  { %v2842_v50 = vpop.f32.mrb[15].mxu0  ;;  %3133 = vmatprep.subr.bf16.mxu0 %v3347_v1 }
 0x222   :  { %3134 = vmatpush3.bf16.msra.mxu0 %v3292_v49  ;;  %v3319_v49 = vld [vmem:[%s4206_s3 + $0x140] sm:$0xff]  }
 0x223   :  { %3135 = vmatprep.subr.bf16.mxu0 %v3347_v1 }
 0x226   :  { %3136 = vmatpush3.bf16.msra.mxu0 %v3294_v11  ;;  %v3321_v11 = vld [vmem:[%s4206_s3 + $0x150] sm:$0xff]  }
 0x227   :  { %3137 = vmatprep.subr.bf16.mxu0 %v3347_v1 }
 0x22a   :  { %3138 = vmatpush3.bf16.msra.mxu0 %v3296_v52  ;;  %v3322_v52 = vld [vmem:[%s4206_s3 + $0x158] sm:$0xff]  }
 0x22b   :  { %3139 = vmatprep.subr.bf16.mxu0 %v3347_v1 }
 0x22e   :  { %3140 = vmatpush3.bf16.msra.mxu0 %v3298_v53  ;;  %v3323_v53 = vld [vmem:[%s4206_s3 + $0x160] sm:$0xff]  }
 0x231   :  { %3142 = vmatmul.mubr.msk.bf16.vlgmr.msra.gmra.mrb[44].mxu0 %vm1914_vm1, %v1883_v36  ;;  %v1807_v36 = vmul.f32 %v3929_v8, %v3929_v8 }
 0x232   :  { %3171 = vmatprep.mubr.msk.f32.mxu0 %vm3348_vm0, %v3347_v1 }
 0x233   :  { %v1808_v44 = vpack.c.bf16 %v1807_v36, %v1807_v36 }
 0x23c   :  { %v899_v54 = vpop.f32.mrb[16].mxu0 }
 0x23d   :  { %v905_v55 = vmul.f32 %v899_v54, %v3721_v18  ;;  %v2881_v56 = vpop.f32.mrb[17].mxu0 }
 0x23e   :  { %v902_v57 = vpop.f32.mrb[18].mxu0 }
 0x23f   :  { %v906_v58 = vpack.c.bf16 %v905_v55, %v905_v55  ;;  %v2882_v59 = vpop.f32.mrb[19].mxu0 }
 0x241   :  { %2900 = vmatmul.mubr.bf16.vlgmr.msra.gmra.mrb[16].mxu1 %v906_v58 }
 0x242   :  { %2924 = vmatpush3.bf16.msra.mxu1 %v3793_v35  ;;  %2939 = vmatprep.mubr.msk.bf16.mxu1 %vm3348_vm0, %v3347_v1  ;;  %v1083_v35 = vmul.f32 %v3721_v18, %v3721_v18  ;;  %v3304_v18 = vld [vmem:[%s4206_s3 + $0xc8] sm:$0xff]  }
 0x243   :  { %2925 = vmatprep.subr.bf16.mxu1 %v3347_v1 }
 0x244   :  { %v1084_v60 = vpack.c.bf16 %v1083_v35, %v1083_v35  ;;  %v2103_v35 = vmul.f32 %v3994_v34, %v3994_v34 }
 0x246   :  { %2926 = vmatpush3.bf16.msra.mxu1 %v3808_v38 }
 0x247   :  { %2927 = vmatprep.subr.bf16.mxu1 %v3347_v1 }
 0x24a   :  { %2928 = vmatpush3.bf16.msra.mxu1 %v3821_v41 }
 0x24b   :  { %2929 = vmatprep.subr.bf16.mxu1 %v3347_v1 }
 0x24e   :  { %2930 = vmatpush3.bf16.msra.mxu1 %v3833_v43 }
 0x24f   :  { %2931 = vmatprep.subr.bf16.mxu1 %v3347_v1 }
 0x252   :  { %2932 = vmatpush3.bf16.msra.mxu1 %v3845_v45 }
 0x253   :  { %2933 = vmatprep.subr.bf16.mxu1 %v3347_v1 }
 0x256   :  { %2934 = vmatpush3.bf16.msra.mxu1 %v3852_v46  ;;  %v3303_v46 = vld [vmem:[%s4206_s3 + $0xc0] sm:$0xff]  }
 0x257   :  { %2935 = vmatprep.subr.bf16.mxu1 %v3347_v1 }
 0x25a   :  { %2936 = vmatpush3.bf16.msra.mxu1 %v3863_v48  ;;  %v3305_v48 = vld [vmem:[%s4206_s3 + $0xd0] sm:$0xff]  }
 0x25b   :  { %2937 = vmatprep.subr.bf16.mxu1 %v3347_v1 }
 0x25c   :  { %v1077_v38 = vpop.f32.mrb[20].mxu0 }
 0x25d   :  { %v1126_v41 = vadd.f32 %v1077_v38, %v721_v42  ;;  %v2921_v43 = vpop.f32.mrb[21].mxu0 }
 0x25e   :  { %2938 = vmatpush3.bf16.msra.mxu1 %v3879_v51  ;;  %v1080_v45 = vpop.f32.mrb[22].mxu0  ;;  %v3306_v51 = vld [vmem:[%s4206_s3 + $0xd8] sm:$0xff]   ;;  %v2104_v43 = vpack.c.bf16 %v2103_v35, %v2103_v35 }
 0x25f   :  { %v2922_v61 = vpop.f32.mrb[23].mxu0  ;;  %2963 = vmatprep.subr.bf16.mxu1 %v3347_v1 }
 0x261   :  { %2940 = vmatmul.mubr.bf16.vlgmr.msra.gmra.mrb[20].mxu1 %v1084_v60 }
 0x262   :  { %2964 = vmatpush3.bf16.msra.mxu1 %v3303_v46  ;;  %2979 = vmatprep.mubr.msk.bf16.mxu1 %vm3348_vm0, %v3347_v1 }
 0x263   :  { %2965 = vmatprep.subr.bf16.mxu1 %v3347_v1 }
 0x266   :  { %2966 = vmatpush3.bf16.msra.mxu1 %v3304_v18 }
 0x267   :  { %2967 = vmatprep.subr.bf16.mxu1 %v3347_v1 }
 0x26a   :  { %2968 = vmatpush3.bf16.msra.mxu1 %v3305_v48 }
 0x26b   :  { %2969 = vmatprep.subr.bf16.mxu1 %v3347_v1 }
 0x26e   :  { %2970 = vmatpush3.bf16.msra.mxu1 %v3306_v51 }
 0x26f   :  { %2971 = vmatprep.subr.bf16.mxu1 %v3347_v1 }
 0x272   :  { %2972 = vmatpush3.bf16.msra.mxu1 %v3307_v62 }
 0x273   :  { %2973 = vmatprep.subr.bf16.mxu1 %v3347_v1 }
 0x276   :  { %2974 = vmatpush3.bf16.msra.mxu1 %v3308_v0 }
 0x277   :  { %2975 = vmatprep.subr.bf16.mxu1 %v3347_v1 }
 0x27a   :  { %2976 = vmatpush3.bf16.msra.mxu1 %v3309_v2 }
 0x27b   :  { %2977 = vmatprep.subr.bf16.mxu1 %v3347_v1 }
 0x27c   :  { %v1261_v4 = vpop.f32.mrb[24].mxu0 }
 0x27d   :  { %v1267_v5 = vmul.f32 %v1261_v4, %v3802_v37  ;;  %v2961_v6 = vpop.f32.mrb[25].mxu0  ;;  %v3312_v37 = vld [vmem:[%s4206_s3 + $0x108] sm:$0xff]  }
 0x27e   :  { %2978 = vmatpush3.bf16.msra.mxu1 %v3310_v3  ;;  %v1264_v7 = vpop.f32.mrb[26].mxu0 }
 0x27f   :  { %v1268_v9 = vpack.c.bf16 %v1267_v5, %v1267_v5  ;;  %v2962_v10 = vpop.f32.mrb[27].mxu0  ;;  %3003 = vmatprep.subr.bf16.mxu1 %v3347_v1 }
 0x280   :  { %v2164_v10 = vld [vmem:[%s4209_s6] sm:$0xff] }
 0x281   :  { %2980 = vmatmul.mubr.bf16.vlgmr.msra.gmra.mrb[24].mxu1 %v1268_v9 }
 0x282   :  { %3004 = vmatpush3.bf16.msra.mxu1 %v3303_v46  ;;  %3019 = vmatprep.mubr.msk.bf16.mxu1 %vm3348_vm0, %v3347_v1 }
 0x283   :  { %3005 = vmatprep.subr.bf16.mxu1 %v3347_v1 }
 0x286   :  { %3006 = vmatpush3.bf16.msra.mxu1 %v3304_v18 }
 0x287   :  { %3007 = vmatprep.subr.bf16.mxu1 %v3347_v1 }
 0x28a   :  { %3008 = vmatpush3.bf16.msra.mxu1 %v3305_v48 }
 0x28b   :  { %3009 = vmatprep.subr.bf16.mxu1 %v3347_v1 }
 0x28e   :  { %3010 = vmatpush3.bf16.msra.mxu1 %v3306_v51 }
 0x28f   :  { %3011 = vmatprep.subr.bf16.mxu1 %v3347_v1 }
 0x292   :  { %3012 = vmatpush3.bf16.msra.mxu1 %v3307_v62 }
 0x293   :  { %3013 = vmatprep.subr.bf16.mxu1 %v3347_v1 }
 0x296   :  { %3014 = vmatpush3.bf16.msra.mxu1 %v3308_v0 }
 0x297   :  { %3015 = vmatprep.subr.bf16.mxu1 %v3347_v1 }
 0x29a   :  { %3016 = vmatpush3.bf16.msra.mxu1 %v3309_v2 }
 0x29b   :  { %3017 = vmatprep.subr.bf16.mxu1 %v3347_v1 }
 0x29c   :  { %v1439_v13 = vpop.f32.mrb[28].mxu0 }
 0x29d   :  { %v1488_v14 = vadd.f32 %v1439_v13, %v1126_v41  ;;  %v3001_v15 = vpop.f32.mrb[29].mxu0  ;;  %v2167_v13 = vld [vmem:[%s4209_s6 + $0x18] sm:$0xff] }
 0x29e   :  { %3018 = vmatpush3.bf16.msra.mxu1 %v3310_v3  ;;  %v1442_v17 = vpop.f32.mrb[30].mxu0 }
 0x29f   :  { %v3002_v20 = vpop.f32.mrb[31].mxu0  ;;  %3043 = vmatprep.subr.bf16.mxu1 %v3347_v1  ;;  %v2169_v17 = vld [vmem:[%s4209_s6 + $0x28] sm:$0x1f] }
 0x2a1   :  { %3020 = vmatmul.mubr.bf16.vlgmr.msra.gmra.mrb[28].mxu1 %v1446_v16  ;;  %v2168_v16 = vld [vmem:[%s4209_s6 + $0x20] sm:$0xff] }
 0x2a2   :  { %3044 = vmatpush3.bf16.msra.mxu1 %v3311_v19  ;;  %3059 = vmatprep.mubr.msk.bf16.mxu1 %vm3348_vm0, %v3347_v1 }
 0x2a3   :  { %3045 = vmatprep.subr.bf16.mxu1 %v3347_v1 }
 0x2a6   :  { %3046 = vmatpush3.bf16.msra.mxu1 %v3312_v37 }
 0x2a7   :  { %3047 = vmatprep.subr.bf16.mxu1 %v3347_v1 }
 0x2aa   :  { %3048 = vmatpush3.bf16.msra.mxu1 %v3313_v21 }
 0x2ab   :  { %3049 = vmatprep.subr.bf16.mxu1 %v3347_v1 }
 0x2ae   :  { %3050 = vmatpush3.bf16.msra.mxu1 %v3314_v23 }
 0x2af   :  { %3051 = vmatprep.subr.bf16.mxu1 %v3347_v1 }
 0x2b2   :  { %3052 = vmatpush3.bf16.msra.mxu1 %v3315_v24 }
 0x2b3   :  { %3053 = vmatprep.subr.bf16.mxu1 %v3347_v1 }
 0x2b6   :  { %3054 = vmatpush3.bf16.msra.mxu1 %v3316_v25 }
 0x2b7   :  { %3055 = vmatprep.subr.bf16.mxu1 %v3347_v1 }
 0x2ba   :  { %3056 = vmatpush3.bf16.msra.mxu1 %v3317_v26 }
 0x2bb   :  { %3057 = vmatprep.subr.bf16.mxu1 %v3347_v1 }
 0x2bc   :  { %v1623_v28 = vpop.f32.mrb[32].mxu0 }
 0x2bd   :  { %v1629_v29 = vmul.f32 %v1623_v28, %v3929_v8  ;;  %v3041_v30 = vpop.f32.mrb[33].mxu0  ;;  %v3320_v8 = vld [vmem:[%s4206_s3 + $0x148] sm:$0xff]  }
 0x2be   :  { %3058 = vmatpush3.bf16.msra.mxu1 %v3318_v27  ;;  %v1626_v31 = vpop.f32.mrb[34].mxu0 }
 0x2bf   :  { %v1630_v32 = vpack.c.bf16 %v1629_v29, %v1629_v29  ;;  %v3042_v33 = vpop.f32.mrb[35].mxu0  ;;  %3083 = vmatprep.subr.bf16.mxu1 %v3347_v1 }
 0x2c1   :  { %3060 = vmatmul.mubr.bf16.vlgmr.msra.gmra.mrb[32].mxu1 %v1630_v32 }
 0x2c2   :  { %3084 = vmatpush3.bf16.msra.mxu1 %v3311_v19  ;;  %3099 = vmatprep.mubr.msk.bf16.mxu1 %vm3348_vm0, %v3347_v1  ;;  %v3181_v19 = vpack.c.bf16 %v2169_v17, %v2168_v16 }
 0x2c3   :  { %3085 = vmatprep.subr.bf16.mxu1 %v3347_v1 }
 0x2c6   :  { %3086 = vmatpush3.bf16.msra.mxu1 %v3312_v37 }
 0x2c7   :  { %3087 = vmatprep.subr.bf16.mxu1 %v3347_v1 }
 0x2ca   :  { %3088 = vmatpush3.bf16.msra.mxu1 %v3313_v21 }
 0x2cb   :  { %3089 = vmatprep.subr.bf16.mxu1 %v3347_v1 }
 0x2ce   :  { %3090 = vmatpush3.bf16.msra.mxu1 %v3314_v23 }
 0x2cf   :  { %3091 = vmatprep.subr.bf16.mxu1 %v3347_v1 }
 0x2d2   :  { %3092 = vmatpush3.bf16.msra.mxu1 %v3315_v24 }
 0x2d3   :  { %3093 = vmatprep.subr.bf16.mxu1 %v3347_v1 }
 0x2d6   :  { %3094 = vmatpush3.bf16.msra.mxu1 %v3316_v25 }
 0x2d7   :  { %3095 = vmatprep.subr.bf16.mxu1 %v3347_v1 }
 0x2da   :  { %3096 = vmatpush3.bf16.msra.mxu1 %v3317_v26 }
 0x2db   :  { %3097 = vmatprep.subr.bf16.mxu1 %v3347_v1 }
 0x2dc   :  { %v1801_v39 = vpop.f32.mrb[36].mxu0 }
 0x2dd   :  { %v1850_v40 = vadd.f32 %v1801_v39, %v1488_v14  ;;  %v3081_v42 = vpop.f32.mrb[37].mxu0  ;;  %v3349_v14 = vmov 0.0|0.0  }
 0x2de   :  { %3098 = vmatpush3.bf16.msra.mxu1 %v3318_v27  ;;  %v1804_v47 = vpop.f32.mrb[38].mxu0  ;;  %3174 = vmatprep.subr.bf16.mxu0 %v3349_v14 }
 0x2df   :  { %v3082_v50 = vpop.f32.mrb[39].mxu0  ;;  %3117 = vmatprep.subr.bf16.mxu1 %v3347_v1 }
 0x2e1   :  { %3100 = vmatmul.mubr.bf16.vlgmr.msra.gmra.mrb[36].mxu1 %v1808_v44 }
 0x2e2   :  { %3118 = vmatpush3.bf16.msra.mxu1 %v3319_v49  ;;  %3127 = vmatprep.mubr.msk.bf16.mxu1 %vm3348_vm0, %v3347_v1 }
 0x2e3   :  { %3119 = vmatprep.subr.bf16.mxu1 %v3347_v1 }
 0x2e6   :  { %3120 = vmatpush3.bf16.msra.mxu1 %v3320_v8 }
 0x2e7   :  { %3121 = vmatprep.subr.bf16.mxu1 %v3347_v1 }
 0x2ea   :  { %3122 = vmatpush3.bf16.msra.mxu1 %v3321_v11 }
 0x2eb   :  { %3123 = vmatprep.subr.bf16.mxu1 %v3347_v1 }
 0x2ee   :  { %3124 = vmatpush3.bf16.msra.mxu1 %v3322_v52 }
 0x2ef   :  { %3125 = vmatprep.subr.bf16.mxu1 %v3347_v1 }
 0x2f0   :  { %v1952_v54 = vpop.f32.mrb[40].mxu0 }
 0x2f1   :  { %v1958_v55 = vmul.f32 %v1952_v54, %v3994_v34  ;;  %v3115_v56 = vpop.f32.mrb[41].mxu0 }
 0x2f2   :  { %3126 = vmatpush3.bf16.msra.mxu1 %v3323_v53  ;;  %v1955_v57 = vpop.f32.mrb[42].mxu0  ;;  %v2488_v56 = vld [vmem:[%s4208_s5] ss:$0 sm:$0xff]  ;;  %s2284_s5 = sld [smem:[#allocation2 + $0x2]] }
 0x2f3   :  { %v1959_v58 = vpack.c.bf16 %v1958_v55, %v1958_v55  ;;  %v3116_v59 = vpop.f32.mrb[43].mxu0  ;;  %3145 = vmatprep.subr.bf16.mxu1 %v3347_v1 }
 0x2f5   :  { %3128 = vmatmul.mubr.msk.bf16.vlgmr.msra.gmra.mrb[40].mxu1 %vm1914_vm1, %v1959_v58 }
 0x2f6   :  { %3146 = vmatpush3.bf16.msra.mxu1 %v3319_v49  ;;  %3155 = vmatprep.mubr.msk.bf16.mxu1 %vm3348_vm0, %v3347_v1 }
 0x2f7   :  { %3147 = vmatprep.subr.bf16.mxu1 %v3347_v1 }
 0x2fa   :  { %3148 = vmatpush3.bf16.msra.mxu1 %v3320_v8 }
 0x2fb   :  { %3149 = vmatprep.subr.bf16.mxu1 %v3347_v1 }
 0x2fe   :  { %3150 = vmatpush3.bf16.msra.mxu1 %v3321_v11 }
 0x2ff   :  { %3151 = vmatprep.subr.bf16.mxu1 %v3347_v1 }
 0x302   :  { %3152 = vmatpush3.bf16.msra.mxu1 %v3322_v52 }
 0x303   :  { %3153 = vmatprep.subr.bf16.mxu1 %v3347_v1 }
 0x304   :  { %v2097_v38 = vpop.f32.mrb[44].mxu0 }
 0x305   :  { %v2149_v41 = vadd.f32 %v2097_v38, %v1850_v40  ;;  %v3143_v60 = vpop.f32.mrb[45].mxu0 }
 0x306   :  { %3154 = vmatpush3.bf16.msra.mxu1 %v3323_v53  ;;  %v2100_v45 = vpop.f32.mrb[46].mxu0 }
 0x307   :  { %v3144_v46 = vpop.f32.mrb[47].mxu0 }
 0x309   :  { %3156 = vmatmul.mubr.msk.bf16.vlgmr.msra.gmra.mrb[44].mxu1 %vm1914_vm1, %v2104_v43 }
 0x314   :  { %v989_v61 = vpop.f32.mrb[16].mxu1 }
 0x315   :  { %v1125_v18 = vadd.f32 %v989_v61, %v3917_v63  ;;  %v2901_v48 = vpop.f32.mrb[17].mxu1  ;;  %v2165_v63 = vld [vmem:[%s4209_s6 + $0x8] sm:$0xff] }
 0x316   :  { %v992_v51 = vpop.f32.mrb[18].mxu1  ;;  %v3175_v12 = vpack.c.bf16 %v2165_v63, %v2164_v10 }
 0x317   :  { %v2902_v62 = vpop.f32.mrb[19].mxu1 }
 0x318   :  { %3176 = vmatpush3.bf16.msra.mxu0 %v3175_v12  ;;  %v2260_v62 = vstv %s46_s12 }
 0x319   :  { %3177 = vmatprep.subr.bf16.mxu0 %v3349_v14 }
 0x334   :  { %v1119_v0 = vpop.f32.mrb[20].mxu1 }
 0x335   :  { %v1127_v34 = vadd.f32 %v1119_v0, %v3960_v22  ;;  %v2941_v2 = vpop.f32.mrb[21].mxu1  ;;  %v2166_v22 = vld [vmem:[%s4209_s6 + $0x10] sm:$0xff]  ;;  %s2283_s6 = sld [smem:[#allocation2 + $0x1]] }
 0x336   :  { %v1122_v1 = vpop.f32.mrb[22].mxu1  ;;  %v3178_v15 = vpack.c.bf16 %v2167_v13, %v2166_v22 }
 0x337   :  { %v2942_v3 = vpop.f32.mrb[23].mxu1 }
 0x338   :  { %3179 = vmatpush3.bf16.msra.mxu0 %v3178_v15 }
 0x339   :  { %3180 = vmatprep.subr.bf16.mxu0 %v3349_v14 }
 0x33b   :  { %v2160_v8 = vstv %s2283_s6 }
 0x33c   :  { %3183 = vmatpush3.bf16.msk.msra.mxu0 %vm3182_vm4, %v3181_v19 }
 0x354   :  { %v1351_v4 = vpop.f32.mrb[24].mxu1 }
 0x355   :  { %v1487_v5 = vadd.f32 %v1351_v4, %v1125_v18  ;;  %v2981_v6 = vpop.f32.mrb[25].mxu1  ;;  %v2266_v18 = vstv %s2284_s5 }
 0x356   :  { %v1354_v7 = vpop.f32.mrb[26].mxu1 }
 0x357   :  { %v2982_v9 = vpop.f32.mrb[27].mxu1 }
 0x374   :  { %v1481_v20 = vpop.f32.mrb[28].mxu1 }
 0x375   :  { %v1489_v37 = vadd.f32 %v1481_v20, %v1127_v34  ;;  %v3021_v21 = vpop.f32.mrb[29].mxu1 }
 0x376   :  { %v1484_v23 = vpop.f32.mrb[30].mxu1 }
 0x377   :  { %v3022_v24 = vpop.f32.mrb[31].mxu1 }
 0x394   :  { %v1713_v25 = vpop.f32.mrb[32].mxu1 }
 0x395   :  { %v1849_v26 = vadd.f32 %v1713_v25, %v1487_v5  ;;  %v3061_v27 = vpop.f32.mrb[33].mxu1 }
 0x396   :  { %v1716_v28 = vpop.f32.mrb[34].mxu1 }
 0x397   :  { %v3062_v29 = vpop.f32.mrb[35].mxu1 }
 0x3b4   :  { %v1843_v30 = vpop.f32.mrb[36].mxu1 }
 0x3b5   :  { %v1851_v31 = vadd.f32 %v1843_v30, %v1489_v37  ;;  %v3101_v32 = vpop.f32.mrb[37].mxu1 }
 0x3b6   :  { %v1846_v33 = vpop.f32.mrb[38].mxu1 }
 0x3b7   :  { %v3102_v36 = vpop.f32.mrb[39].mxu1 }
 0x3c8   :  { %v2027_v39 = vpop.f32.mrb[40].mxu1 }
 0x3c9   :  { %v2148_v40 = vadd.f32 %v2027_v39, %v1849_v26  ;;  %v3129_v42 = vpop.f32.mrb[41].mxu1 }
 0x3ca   :  { %v2030_v44 = vpop.f32.mrb[42].mxu1 }
 0x3cb   :  { %v2151_v47 = vadd.f32 %v2149_v41, %v2148_v40  ;;  %v3130_v49 = vpop.f32.mrb[43].mxu1  ;;  %v2489_v41 = vld [vmem:[%s4210_s7] ss:$0 sm:$0xff] }
 0x3cd   :  { %v2159_v57 = vadd.f32 %v2488_v56, %v2151_v47 }
 0x3dc   :  { %v2142_v50 = vpop.f32.mrb[44].mxu1 }
 0x3dd   :  { %v2150_v11 = vadd.f32 %v2142_v50, %v1851_v31  ;;  %v3157_v52 = vpop.f32.mrb[45].mxu1 }
 0x3de   :  { %v2145_v53 = vpop.f32.mrb[46].mxu1 }
 0x3df   :  { %v2161_v54 = vadd.f32 %v2160_v8, %v2150_v11  ;;  %v3158_v55 = vpop.f32.mrb[47].mxu1 }
 0x3e1   :  { %3324 = vrcp.f32 %v2161_v54 }
 0x3eb   :  { %v3325_v58 = vpop.eup %3324 }
 0x3ec   :  { %v2163_v59 = vmul.f32 %v3325_v58, %v2159_v57 }
 0x3ee   :  { %3172 = vmatmul.mubr.msk.f32.vlgmr.msra.gmra.mrb[48].mxu0 %vm2177_vm5, %v2163_v59  ;;  %v2262_v35 = vmul.f32 %v2163_v59, %v2163_v59 }
 0x3f0   :  { %v2263_v38 = vsel %vm2256_vm6, %v2262_v35, 0.0 }
 0x3f1   :  { %2264 = vadd.xlane.f32.xlu0 %v2263_v38 }
 0x47e   :  { %v2265_v48 = vpop.xlane.xlu0 %2264 }
 0x47f   :  { %v2267_v51 = vadd.f32 %v2266_v18, %v2265_v48 }
 0x481   :  { %3326 = vrcp.f32 %v2267_v51 }
 0x48b   :  { %v3327_v2 = vpop.eup %3326 }
 0x4c1   :  { %v2251_v43 = vpop.f32.mrb[48].mxu0 }
 0x4c2   :  { %v2252_v60 = vadd.f32 %v2489_v41, %v2251_v43  ;;  %v3173_v45 = vpop.f32.mrb[49].mxu0 }
 0x4c4   :  { %v2255_v46 = vmul.f32 %v2252_v60, %v2163_v59 }
 0x4c6   :  { %v2257_v61 = vsel %vm2256_vm6, %v2255_v46, 0.0 }
 0x4c7   :  { %2258 = vadd.xlane.f32.xlu0 %v2257_v61 }
 0x554   :  { %v2259_v0 = vpop.xlane.xlu0 %2258 }
 0x555   :  { %v2261_v34 = vadd.f32 %v2260_v62, %v2259_v0 }
 0x557   :  { %v2269_v1 = vmul.f32 %v3327_v2, %v2261_v34 }
 0x559   :  { %v2270_v3 = vsub.f32 %v2269_v1, %v2269_v1 }
 0x55b   :  { %v2271_v4 = vmul.f32 1.442695, %v2270_v3 }
 0x55d   :  { %3328 = vpow2.f32 %v2271_v4 }
 0x567   :  { %v3329_v5 = vpop.eup %3328 }
 0x568   :  { %3330 = vrcp.f32 %v3329_v5 }
 0x572   :  { %v3331_v6 = vpop.eup %3330 }
 0x573   :  { %v2275_v7 = vmul.f32 %v3331_v6, %v3329_v5 }
 0x575   :  { %2277 = vst.msk [vmem:[%s4212_s9] sm:$0x3] %vm2276_vm7, %v2275_v7 }
 0x576   :  { %2282 = vsyncpa [#allocation3], 1 }

</bundles_post_ra>
